<compile_context>
chip_gen: v7x
topology: tpu7x:2x2x1
jax: 0.10.0
libtpu: 0.0.40
codegen_flags: <defaults>
</compile_context>

<pallas_src>
import functools

import jax
import jax.numpy as jnp
from jax.experimental import pallas as pl
from jax.experimental.pallas import tpu as pltpu


def _round_up(x, m):
    return (x + m - 1) // m * m


def _layer_norm(x, g, b, eps=1e-5):
    mu = jnp.mean(x, axis=-1, keepdims=True)
    var = jnp.mean((x - mu) ** 2, axis=-1, keepdims=True)
    return (x - mu) * jax.lax.rsqrt(var + eps) * g + b


def encoder_layer_kernel(x_ref, wqkv_ref, wo_ref, w1_ref, w2_ref, vec_ref,
                         out_ref, *, num_heads):
    """One grid step == (batch block bb, encoder layer l).

    The activation lives in the output block, resident in VMEM across the whole
    L axis (same block index for every l), so only layer weights stream per step.
    """
    l = pl.program_id(1)

    @pl.when(l == 0)
    def _():
        out_ref[...] = x_ref[...]          # initialize carry from the embedding

    Bt, S, E = out_ref.shape
    H = num_heads
    dh = E // H
    F = w1_ref.shape[2]
    M = Bt * S
    scale = 1.0 / jnp.sqrt(jnp.float32(dh))
    bf16 = jnp.bfloat16

    # packed per-layer vectors: one (8, W) slab -> a single DMA per layer
    vecs = vec_ref[0]
    bqkv = vecs[0:1, :3 * E]
    bo   = vecs[1:2, :E]
    ln1g = vecs[2:3, :E]
    ln1b = vecs[3:4, :E]
    b1   = vecs[4:5, :F]
    b2   = vecs[5:6, :E]
    ln2g = vecs[6:7, :E]
    ln2b = vecs[7:8, :E]

    x = out_ref[...].reshape(M, E)         # (M, E) f32 carry, M = Bt*S

    # ---- multi-head self-attention -----------------------------------------
    # fused QKV projection: one lane-dense (M, E) @ (E, 3E) MXU pass
    qkv = jnp.dot(x.astype(bf16), wqkv_ref[0],
                  preferred_element_type=jnp.float32) + bqkv        # (M, 3E) f32
    qkv = qkv.reshape(Bt, S, 3 * E)

    # attention core per head (the score / AV matmuls contract over dh / S by
    # construction; the python loop only unrolls instructions, MXU work is the same)
    outs = []
    for h in range(H):
        q = (qkv[:, :, h * dh:(h + 1) * dh] * scale).astype(bf16)
        k = qkv[:, :, E + h * dh:E + (h + 1) * dh].astype(bf16)
        v = qkv[:, :, 2 * E + h * dh:2 * E + (h + 1) * dh].astype(bf16)
        s = jnp.einsum('bqd,bkd->bqk', q, k,
                       preferred_element_type=jnp.float32)          # (Bt, S, S)
        s = s - jnp.max(s, axis=-1, keepdims=True)
        p = jnp.exp(s)
        denom = jnp.sum(p, axis=-1, keepdims=True)                  # (Bt, S, 1)
        o = jnp.einsum('bqk,bkd->bqd', p.astype(bf16), v,
                       preferred_element_type=jnp.float32)          # (Bt, S, dh)
        # deferred softmax normalization: scale o (S*dh) instead of p (S*S)
        outs.append(o * pl.reciprocal(denom, approx=True))
    o = jnp.concatenate(outs, axis=-1).reshape(M, E)                # (M, H*dh)

    # single output projection, K = E (full MXU contraction depth)
    attn = jnp.dot(o.astype(bf16), wo_ref[0],
                   preferred_element_type=jnp.float32) + bo         # (M, E)

    # post-LN residual (norm_first=False); dropout is identity in eval mode
    x = _layer_norm(x + attn, ln1g, ln1b)

    # ---- feed-forward: Linear -> ReLU -> Linear -----------------------------
    h1 = jnp.dot(x.astype(bf16), w1_ref[0],
                 preferred_element_type=jnp.float32) + b1
    h1 = jnp.maximum(h1, 0.0)
    ff = jnp.dot(h1.astype(bf16), w2_ref[0],
                 preferred_element_type=jnp.float32) + b2
    x = _layer_norm(x + ff, ln2g, ln2b)

    out_ref[...] = x.reshape(Bt, S, E)
    # TODO(synk): for long sequences additionally tile S with a flash-style
    # online-softmax accumulator instead of holding the full (S,S) score tile.


def fc_kernel(x_ref, w_ref, b_ref, out_ref):
    out_ref[...] = (jnp.dot(x_ref[...].astype(jnp.bfloat16), w_ref[...],
                            preferred_element_type=jnp.float32) + b_ref[...])


def _pick_tile(dim, candidates):
    for c in candidates:
        if c <= dim and dim % c == 0:
            return c
    return dim


def _vmem_limit_bytes():
    try:
        cap = pltpu.get_tpu_info().vmem_capacity_bytes
    except Exception:
        cap = 64 * 1024 * 1024                 # conservative (v7x-sized) fallback
    return int(min(cap * 3 // 4, 100 * 1024 * 1024))


def _pick_bt(B, S, E, F, vmem_budget_bytes):
    """Largest batch block that fits a rough f32-activation budget while keeping
    >= 2 parallel batch blocks (megacore on v7x)."""
    def act_bytes(bt):
        m = bt * S
        return 4 * (m * 3 * E + bt * S * S + m * F + 6 * m * E)
    best = 1
    for cand in range(1, B + 1):
        if B % cand or B // cand < 2 or act_bytes(cand) > vmem_budget_bytes:
            continue
        best = cand
    return best


def init_params(key, vocab_size, embed_dim, num_heads, num_layers, dim_feedforward):
    E, H, L, F, V = embed_dim, num_heads, num_layers, dim_feedforward, vocab_size
    assert E % H == 0
    ks = jax.random.split(key, 6)
    std = 0.02
    f32, bf16 = jnp.float32, jnp.bfloat16

    def w(k, shape):  # matmul weights in bf16 (f32 accumulation in-kernel)
        return (jax.random.normal(k, shape, f32) * std).astype(bf16)

    # packed per-layer vector slab, rows = [bqkv, bo, ln1_g, ln1_b, b1, b2, ln2_g, ln2_b]
    W = _round_up(max(3 * E, F), 128)
    def pad_row(a):
        return jnp.pad(a, ((0, 0), (0, W - a.shape[-1])))
    vec_rows = [jnp.zeros((L, 3 * E), f32), jnp.zeros((L, E), f32),
                jnp.ones((L, E), f32), jnp.zeros((L, E), f32),
                jnp.zeros((L, F), f32), jnp.zeros((L, E), f32),
                jnp.ones((L, E), f32), jnp.zeros((L, E), f32)]
    vecs = jnp.stack([pad_row(r) for r in vec_rows], axis=1)        # (L, 8, W)

    return {
        "embedding": jax.random.normal(ks[0], (V, E), f32) * std,
        # fused in-proj: columns grouped [q_h0..q_h(H-1) | k_h0.. | v_h0..]
        "wqkv": w(ks[1], (L, E, 3 * E)),
        "wo":   w(ks[2], (L, E, E)),
        "w1":   w(ks[3], (L, E, F)),
        "w2":   w(ks[4], (L, F, E)),
        "vecs": vecs,
        # final vocab projection
        "wfc":  w(ks[5], (E, V)),
        "bfc":  jnp.zeros((1, V), f32),
        "num_heads": H,
    }


def transformer_forward(tokens, params):
    # Embedding lookup is a gather (glue op outside the kernel).
    emb = params["embedding"]                       # (V, E) f32
    x = jnp.take(emb, tokens, axis=0)               # (B, S, E) f32
    B, S, E = x.shape
    V = emb.shape[0]
    L = params["wqkv"].shape[0]
    H = params["num_heads"]
    F = params["w1"].shape[2]

    vmem_limit = _vmem_limit_bytes()
    Bt = _pick_bt(B, S, E, F, vmem_limit // 3)

    weights = [params[n] for n in ("wqkv", "wo", "w1", "w2", "vecs")]

    # ---- encoder: grid = (batch blocks, layers); weights streamed per layer ---
    enc = pl.pallas_call(
        functools.partial(encoder_layer_kernel, num_heads=H),
        out_shape=jax.ShapeDtypeStruct((B, S, E), jnp.float32),
        grid=(B // Bt, L),
        in_specs=[pl.BlockSpec((Bt, S, E), lambda bb, l: (bb, 0, 0))]
                + [pl.BlockSpec((1,) + wgt.shape[1:], lambda bb, l: (l, 0, 0))
                   for wgt in weights],
        out_specs=pl.BlockSpec((Bt, S, E), lambda bb, l: (bb, 0, 0)),
        compiler_params=pltpu.CompilerParams(
            dimension_semantics=("parallel", "arbitrary"),
            vmem_limit_bytes=vmem_limit,
        ),
    )(x, *weights)

    # ---- LM head: (M,E)@(E,Vp); vocab axis OUTER so wfc tiles stream once -----
    M = B * S
    Vp = _round_up(V, 128)                          # lane-dense unmasked stores
    wfc, bfc = params["wfc"], params["bfc"]
    if Vp != V:
        wfc = jnp.pad(wfc, ((0, 0), (0, Vp - V)))
        bfc = jnp.pad(bfc, ((0, 0), (0, Vp - V)))
    xm = enc.reshape(M, E)
    tm = _pick_tile(M, (1024, 512, 256, 128, 64, 32, 16, 8))
    tv = _pick_tile(Vp, (4096, 2048, 1024, 512, 256, 128))
    logits = pl.pallas_call(
        fc_kernel,
        out_shape=jax.ShapeDtypeStruct((M, Vp), jnp.float32),
        grid=(Vp // tv, M // tm),                   # vocab outer, rows inner
        in_specs=[pl.BlockSpec((tm, E), lambda j, i: (i, 0)),
                  pl.BlockSpec((E, tv), lambda j, i: (0, j)),
                  pl.BlockSpec((1, tv), lambda j, i: (0, j))],
        out_specs=pl.BlockSpec((tm, tv), lambda j, i: (i, j)),
        compiler_params=pltpu.CompilerParams(
            dimension_semantics=("parallel", "parallel"),
            vmem_limit_bytes=vmem_limit,
        ),
    )(xm, wfc, bfc)
    return logits[:, :V].reshape(B, S, V)


if __name__ == "__main__":
    # Small, forward-consistent shapes.
    vocab_size = 64
    embed_dim = 32
    num_heads = 4
    num_layers = 2
    dim_feedforward = 2048   # PyTorch nn.TransformerEncoderLayer default
    B, S = 2, 8

    key = jax.random.PRNGKey(0)
    k_tok, k_par = jax.random.split(key)
    tokens = jax.random.randint(k_tok, (B, S), 0, vocab_size, dtype=jnp.int32)
    params = init_params(k_par, vocab_size, embed_dim, num_heads, num_layers,
                         dim_feedforward)

    logits = transformer_forward(tokens, params)
    jax.block_until_ready(logits)
    assert logits.shape == (B, S, vocab_size)
    assert logits.dtype == jnp.float32
    print("KERNEL_OK")
</pallas_src>

<mosaic_0001>
module attributes {stable_mosaic.version = 11 : i64} {
  func.func @encoder_layer_kernel(%arg0: i32, %arg1: i32, %arg2: memref<1x8x32xf32, #tpu.memory_space<vmem>>, %arg3: memref<1x32x96xbf16, #tpu.memory_space<vmem>>, %arg4: memref<1x32x32xbf16, #tpu.memory_space<vmem>>, %arg5: memref<1x32x2048xbf16, #tpu.memory_space<vmem>>, %arg6: memref<1x2048x32xbf16, #tpu.memory_space<vmem>>, %arg7: memref<1x8x2048xf32, #tpu.memory_space<vmem>>, %arg8: memref<1x8x32xf32, #tpu.memory_space<vmem>>) attributes {dimension_semantics = [#tpu.dimension_semantics<parallel>, #tpu.dimension_semantics<arbitrary>], iteration_bounds = array<i64: 2, 2>, scalar_prefetch = 0 : i64, scratch_operands = 0 : i64, tpu.core_type = #tpu.core_type<tc>, window_params = [{transform_indices = @transform_0, window_bounds = array<i64: 1, 8, 32>}, {transform_indices = @transform_1, window_bounds = array<i64: 1, 32, 96>}, {transform_indices = @transform_2, window_bounds = array<i64: 1, 32, 32>}, {transform_indices = @transform_3, window_bounds = array<i64: 1, 32, 2048>}, {transform_indices = @transform_4, window_bounds = array<i64: 1, 2048, 32>}, {transform_indices = @transform_5, window_bounds = array<i64: 1, 8, 2048>}, {transform_indices = @transform_6, window_bounds = array<i64: 1, 8, 32>}]} {
    %c0_i32 = arith.constant 0 : i32
    %0 = arith.cmpi eq, %arg1, %c0_i32 : i32
    %1 = arith.extui %0 : i1 to i32
    %c0_i32_0 = arith.constant 0 : i32
    %2 = arith.cmpi ne, %1, %c0_i32_0 : i32
    scf.if %2 {
      %c0_53 = arith.constant 0 : index
      %c0_54 = arith.constant 0 : index
      %c0_55 = arith.constant 0 : index
      %178 = vector.load %arg2[%c0_53, %c0_54, %c0_55] : memref<1x8x32xf32, #tpu.memory_space<vmem>>, vector<1x8x32xf32>
      %c0_56 = arith.constant 0 : index
      %c0_57 = arith.constant 0 : index
      %c0_58 = arith.constant 0 : index
      %179 = vector.load %arg8[%c0_56, %c0_57, %c0_58] : memref<1x8x32xf32, #tpu.memory_space<vmem>>, vector<1x8x32xf32>
      tpu.vector_store %arg8[%c0_56, %c0_57, %c0_58], %178 {strides = array<i32>} : memref<1x8x32xf32, #tpu.memory_space<vmem>>, vector<1x8x32xf32>,
    } else {
    }
    %cst = arith.constant 8.000000e+00 : f32
    %3 = math.sqrt %cst : f32
    %cst_1 = arith.constant 1.000000e+00 : f32
    %4 = arith.divf %cst_1, %3 : f32
    %c0 = arith.constant 0 : index
    %c0_2 = arith.constant 0 : index
    %c0_3 = arith.constant 0 : index
    %5 = vector.load %arg7[%c0, %c0_2, %c0_3] : memref<1x8x2048xf32, #tpu.memory_space<vmem>>, vector<1x8x2048xf32>
    %6 = vector.shape_cast %5 : vector<1x8x2048xf32> to vector<8x2048xf32>
    %7 = vector.extract_strided_slice %6 {offsets = [0, 0], sizes = [1, 96], strides = [1, 1]} : vector<8x2048xf32> to vector<1x96xf32>
    %8 = vector.extract_strided_slice %6 {offsets = [1, 0], sizes = [1, 32], strides = [1, 1]} : vector<8x2048xf32> to vector<1x32xf32>
    %9 = vector.extract_strided_slice %6 {offsets = [2, 0], sizes = [1, 32], strides = [1, 1]} : vector<8x2048xf32> to vector<1x32xf32>
    %10 = vector.extract_strided_slice %6 {offsets = [3, 0], sizes = [1, 32], strides = [1, 1]} : vector<8x2048xf32> to vector<1x32xf32>
    %11 = vector.extract_strided_slice %6 {offsets = [4, 0], sizes = [1, 2048], strides = [1, 1]} : vector<8x2048xf32> to vector<1x2048xf32>
    %12 = vector.extract_strided_slice %6 {offsets = [5, 0], sizes = [1, 32], strides = [1, 1]} : vector<8x2048xf32> to vector<1x32xf32>
    %13 = vector.extract_strided_slice %6 {offsets = [6, 0], sizes = [1, 32], strides = [1, 1]} : vector<8x2048xf32> to vector<1x32xf32>
    %14 = vector.extract_strided_slice %6 {offsets = [7, 0], sizes = [1, 32], strides = [1, 1]} : vector<8x2048xf32> to vector<1x32xf32>
    %c0_4 = arith.constant 0 : index
    %c0_5 = arith.constant 0 : index
    %c0_6 = arith.constant 0 : index
    %15 = vector.load %arg8[%c0_4, %c0_5, %c0_6] : memref<1x8x32xf32, #tpu.memory_space<vmem>>, vector<1x8x32xf32>
    %16 = vector.shape_cast %15 : vector<1x8x32xf32> to vector<8x32xf32>
    %17 = arith.truncf %16 : vector<8x32xf32> to vector<8x32xbf16>
    %c0_7 = arith.constant 0 : index
    %c0_8 = arith.constant 0 : index
    %c0_9 = arith.constant 0 : index
    %18 = vector.load %arg3[%c0_7, %c0_8, %c0_9] : memref<1x32x96xbf16, #tpu.memory_space<vmem>>, vector<1x32x96xbf16>
    %19 = vector.shape_cast %18 : vector<1x32x96xbf16> to vector<32x96xbf16>
    %cst_10 = arith.constant dense<0.000000e+00> : vector<8x96xf32>
    %20 = tpu.matmul %17, %19, %cst_10 {dimension_numbers = #tpu.dot_dimension_numbers<[1], [0], [0], [1], [0, 0, 1, 1], [], []>} : vector<8x32xbf16>, vector<32x96xbf16>, vector<8x96xf32> -> vector<8x96xf32>
    %21 = vector.broadcast %7 : vector<1x96xf32> to vector<8x96xf32>
    %22 = arith.addf %20, %21 : vector<8x96xf32>
    %23 = vector.shape_cast %22 : vector<8x96xf32> to vector<1x8x96xf32>
    %24 = vector.extract_strided_slice %23 {offsets = [0, 0, 0], sizes = [1, 8, 8], strides = [1, 1, 1]} : vector<1x8x96xf32> to vector<1x8x8xf32>
    %25 = vector.broadcast %4 : f32 to vector<1x8x8xf32>
    %26 = arith.mulf %24, %25 : vector<1x8x8xf32>
    %27 = arith.truncf %26 : vector<1x8x8xf32> to vector<1x8x8xbf16>
    %28 = vector.extract_strided_slice %23 {offsets = [0, 0, 32], sizes = [1, 8, 8], strides = [1, 1, 1]} : vector<1x8x96xf32> to vector<1x8x8xf32>
    %29 = arith.truncf %28 : vector<1x8x8xf32> to vector<1x8x8xbf16>
    %30 = vector.extract_strided_slice %23 {offsets = [0, 0, 64], sizes = [1, 8, 8], strides = [1, 1, 1]} : vector<1x8x96xf32> to vector<1x8x8xf32>
    %31 = arith.truncf %30 : vector<1x8x8xf32> to vector<1x8x8xbf16>
    "tpu.trace_start"() <{level = 10 : i32, message = "bqd,bkd->bqk"}> : () -> ()
    %cst_11 = arith.constant dense<0.000000e+00> : vector<1x8x8xf32>
    %32 = tpu.matmul %27, %29, %cst_11 {dimension_numbers = #tpu.dot_dimension_numbers<[2], [2], [1], [1], [0, 0, 0, 1, 1, 1], [0], [0]>} : vector<1x8x8xbf16>, vector<1x8x8xbf16>, vector<1x8x8xf32> -> vector<1x8x8xf32>
    "tpu.trace_stop"() : () -> ()
    %cst_12 = arith.constant dense<0xFF800000> : vector<1x8xf32>
    %33 = vector.multi_reduction <maximumf>, %32, %cst_12 [2] : vector<1x8x8xf32> to vector<1x8xf32>
    %34 = vector.shape_cast %33 : vector<1x8xf32> to vector<1x8x1xf32>
    %35 = vector.broadcast %34 : vector<1x8x1xf32> to vector<1x8x8xf32>
    %36 = arith.subf %32, %35 : vector<1x8x8xf32>
    %37 = math.exp %36 : vector<1x8x8xf32>
    %cst_13 = arith.constant dense<0.000000e+00> : vector<1x8xf32>
    %38 = vector.multi_reduction <add>, %37, %cst_13 [2] : vector<1x8x8xf32> to vector<1x8xf32>
    %39 = vector.shape_cast %38 : vector<1x8xf32> to vector<1x8x1xf32>
    %40 = arith.truncf %37 : vector<1x8x8xf32> to vector<1x8x8xbf16>
    "tpu.trace_start"() <{level = 10 : i32, message = "bqk,bkd->bqd"}> : () -> ()
    %cst_14 = arith.constant dense<0.000000e+00> : vector<1x8x8xf32>
    %41 = tpu.matmul %40, %31, %cst_14 {dimension_numbers = #tpu.dot_dimension_numbers<[2], [1], [1], [2], [0, 0, 0, 1, 1, 2], [0], [0]>} : vector<1x8x8xbf16>, vector<1x8x8xbf16>, vector<1x8x8xf32> -> vector<1x8x8xf32>
    "tpu.trace_stop"() : () -> ()
    %42 = tpu.reciprocal %39 {approx = true} : vector<1x8x1xf32> -> vector<1x8x1xf32>
    %43 = vector.broadcast %42 : vector<1x8x1xf32> to vector<1x8x8xf32>
    %44 = arith.mulf %41, %43 : vector<1x8x8xf32>
    %45 = vector.extract_strided_slice %23 {offsets = [0, 0, 8], sizes = [1, 8, 8], strides = [1, 1, 1]} : vector<1x8x96xf32> to vector<1x8x8xf32>
    %46 = vector.broadcast %4 : f32 to vector<1x8x8xf32>
    %47 = arith.mulf %45, %46 : vector<1x8x8xf32>
    %48 = arith.truncf %47 : vector<1x8x8xf32> to vector<1x8x8xbf16>
    %49 = vector.extract_strided_slice %23 {offsets = [0, 0, 40], sizes = [1, 8, 8], strides = [1, 1, 1]} : vector<1x8x96xf32> to vector<1x8x8xf32>
    %50 = arith.truncf %49 : vector<1x8x8xf32> to vector<1x8x8xbf16>
    %51 = vector.extract_strided_slice %23 {offsets = [0, 0, 72], sizes = [1, 8, 8], strides = [1, 1, 1]} : vector<1x8x96xf32> to vector<1x8x8xf32>
    %52 = arith.truncf %51 : vector<1x8x8xf32> to vector<1x8x8xbf16>
    "tpu.trace_start"() <{level = 10 : i32, message = "bqd,bkd->bqk"}> : () -> ()
    %cst_15 = arith.constant dense<0.000000e+00> : vector<1x8x8xf32>
    %53 = tpu.matmul %48, %50, %cst_15 {dimension_numbers = #tpu.dot_dimension_numbers<[2], [2], [1], [1], [0, 0, 0, 1, 1, 1], [0], [0]>} : vector<1x8x8xbf16>, vector<1x8x8xbf16>, vector<1x8x8xf32> -> vector<1x8x8xf32>
    "tpu.trace_stop"() : () -> ()
    %cst_16 = arith.constant dense<0xFF800000> : vector<1x8xf32>
    %54 = vector.multi_reduction <maximumf>, %53, %cst_16 [2] : vector<1x8x8xf32> to vector<1x8xf32>
    %55 = vector.shape_cast %54 : vector<1x8xf32> to vector<1x8x1xf32>
    %56 = vector.broadcast %55 : vector<1x8x1xf32> to vector<1x8x8xf32>
    %57 = arith.subf %53, %56 : vector<1x8x8xf32>
    %58 = math.exp %57 : vector<1x8x8xf32>
    %cst_17 = arith.constant dense<0.000000e+00> : vector<1x8xf32>
    %59 = vector.multi_reduction <add>, %58, %cst_17 [2] : vector<1x8x8xf32> to vector<1x8xf32>
    %60 = vector.shape_cast %59 : vector<1x8xf32> to vector<1x8x1xf32>
    %61 = arith.truncf %58 : vector<1x8x8xf32> to vector<1x8x8xbf16>
    "tpu.trace_start"() <{level = 10 : i32, message = "bqk,bkd->bqd"}> : () -> ()
    %cst_18 = arith.constant dense<0.000000e+00> : vector<1x8x8xf32>
    %62 = tpu.matmul %61, %52, %cst_18 {dimension_numbers = #tpu.dot_dimension_numbers<[2], [1], [1], [2], [0, 0, 0, 1, 1, 2], [0], [0]>} : vector<1x8x8xbf16>, vector<1x8x8xbf16>, vector<1x8x8xf32> -> vector<1x8x8xf32>
    "tpu.trace_stop"() : () -> ()
    %63 = tpu.reciprocal %60 {approx = true} : vector<1x8x1xf32> -> vector<1x8x1xf32>
    %64 = vector.broadcast %63 : vector<1x8x1xf32> to vector<1x8x8xf32>
    %65 = arith.mulf %62, %64 : vector<1x8x8xf32>
    %66 = vector.extract_strided_slice %23 {offsets = [0, 0, 16], sizes = [1, 8, 8], strides = [1, 1, 1]} : vector<1x8x96xf32> to vector<1x8x8xf32>
    %67 = vector.broadcast %4 : f32 to vector<1x8x8xf32>
    %68 = arith.mulf %66, %67 : vector<1x8x8xf32>
    %69 = arith.truncf %68 : vector<1x8x8xf32> to vector<1x8x8xbf16>
    %70 = vector.extract_strided_slice %23 {offsets = [0, 0, 48], sizes = [1, 8, 8], strides = [1, 1, 1]} : vector<1x8x96xf32> to vector<1x8x8xf32>
    %71 = arith.truncf %70 : vector<1x8x8xf32> to vector<1x8x8xbf16>
    %72 = vector.extract_strided_slice %23 {offsets = [0, 0, 80], sizes = [1, 8, 8], strides = [1, 1, 1]} : vector<1x8x96xf32> to vector<1x8x8xf32>
    %73 = arith.truncf %72 : vector<1x8x8xf32> to vector<1x8x8xbf16>
    "tpu.trace_start"() <{level = 10 : i32, message = "bqd,bkd->bqk"}> : () -> ()
    %cst_19 = arith.constant dense<0.000000e+00> : vector<1x8x8xf32>
    %74 = tpu.matmul %69, %71, %cst_19 {dimension_numbers = #tpu.dot_dimension_numbers<[2], [2], [1], [1], [0, 0, 0, 1, 1, 1], [0], [0]>} : vector<1x8x8xbf16>, vector<1x8x8xbf16>, vector<1x8x8xf32> -> vector<1x8x8xf32>
    "tpu.trace_stop"() : () -> ()
    %cst_20 = arith.constant dense<0xFF800000> : vector<1x8xf32>
    %75 = vector.multi_reduction <maximumf>, %74, %cst_20 [2] : vector<1x8x8xf32> to vector<1x8xf32>
    %76 = vector.shape_cast %75 : vector<1x8xf32> to vector<1x8x1xf32>
    %77 = vector.broadcast %76 : vector<1x8x1xf32> to vector<1x8x8xf32>
    %78 = arith.subf %74, %77 : vector<1x8x8xf32>
    %79 = math.exp %78 : vector<1x8x8xf32>
    %cst_21 = arith.constant dense<0.000000e+00> : vector<1x8xf32>
    %80 = vector.multi_reduction <add>, %79, %cst_21 [2] : vector<1x8x8xf32> to vector<1x8xf32>
    %81 = vector.shape_cast %80 : vector<1x8xf32> to vector<1x8x1xf32>
    %82 = arith.truncf %79 : vector<1x8x8xf32> to vector<1x8x8xbf16>
    "tpu.trace_start"() <{level = 10 : i32, message = "bqk,bkd->bqd"}> : () -> ()
    %cst_22 = arith.constant dense<0.000000e+00> : vector<1x8x8xf32>
    %83 = tpu.matmul %82, %73, %cst_22 {dimension_numbers = #tpu.dot_dimension_numbers<[2], [1], [1], [2], [0, 0, 0, 1, 1, 2], [0], [0]>} : vector<1x8x8xbf16>, vector<1x8x8xbf16>, vector<1x8x8xf32> -> vector<1x8x8xf32>
    "tpu.trace_stop"() : () -> ()
    %84 = tpu.reciprocal %81 {approx = true} : vector<1x8x1xf32> -> vector<1x8x1xf32>
    %85 = vector.broadcast %84 : vector<1x8x1xf32> to vector<1x8x8xf32>
    %86 = arith.mulf %83, %85 : vector<1x8x8xf32>
    %87 = vector.extract_strided_slice %23 {offsets = [0, 0, 24], sizes = [1, 8, 8], strides = [1, 1, 1]} : vector<1x8x96xf32> to vector<1x8x8xf32>
    %88 = vector.broadcast %4 : f32 to vector<1x8x8xf32>
    %89 = arith.mulf %87, %88 : vector<1x8x8xf32>
    %90 = arith.truncf %89 : vector<1x8x8xf32> to vector<1x8x8xbf16>
    %91 = vector.extract_strided_slice %23 {offsets = [0, 0, 56], sizes = [1, 8, 8], strides = [1, 1, 1]} : vector<1x8x96xf32> to vector<1x8x8xf32>
    %92 = arith.truncf %91 : vector<1x8x8xf32> to vector<1x8x8xbf16>
    %93 = vector.extract_strided_slice %23 {offsets = [0, 0, 88], sizes = [1, 8, 8], strides = [1, 1, 1]} : vector<1x8x96xf32> to vector<1x8x8xf32>
    %94 = arith.truncf %93 : vector<1x8x8xf32> to vector<1x8x8xbf16>
    "tpu.trace_start"() <{level = 10 : i32, message = "bqd,bkd->bqk"}> : () -> ()
    %cst_23 = arith.constant dense<0.000000e+00> : vector<1x8x8xf32>
    %95 = tpu.matmul %90, %92, %cst_23 {dimension_numbers = #tpu.dot_dimension_numbers<[2], [2], [1], [1], [0, 0, 0, 1, 1, 1], [0], [0]>} : vector<1x8x8xbf16>, vector<1x8x8xbf16>, vector<1x8x8xf32> -> vector<1x8x8xf32>
    "tpu.trace_stop"() : () -> ()
    %cst_24 = arith.constant dense<0xFF800000> : vector<1x8xf32>
    %96 = vector.multi_reduction <maximumf>, %95, %cst_24 [2] : vector<1x8x8xf32> to vector<1x8xf32>
    %97 = vector.shape_cast %96 : vector<1x8xf32> to vector<1x8x1xf32>
    %98 = vector.broadcast %97 : vector<1x8x1xf32> to vector<1x8x8xf32>
    %99 = arith.subf %95, %98 : vector<1x8x8xf32>
    %100 = math.exp %99 : vector<1x8x8xf32>
    %cst_25 = arith.constant dense<0.000000e+00> : vector<1x8xf32>
    %101 = vector.multi_reduction <add>, %100, %cst_25 [2] : vector<1x8x8xf32> to vector<1x8xf32>
    %102 = vector.shape_cast %101 : vector<1x8xf32> to vector<1x8x1xf32>
    %103 = arith.truncf %100 : vector<1x8x8xf32> to vector<1x8x8xbf16>
    "tpu.trace_start"() <{level = 10 : i32, message = "bqk,bkd->bqd"}> : () -> ()
    %cst_26 = arith.constant dense<0.000000e+00> : vector<1x8x8xf32>
    %104 = tpu.matmul %103, %94, %cst_26 {dimension_numbers = #tpu.dot_dimension_numbers<[2], [1], [1], [2], [0, 0, 0, 1, 1, 2], [0], [0]>} : vector<1x8x8xbf16>, vector<1x8x8xbf16>, vector<1x8x8xf32> -> vector<1x8x8xf32>
    "tpu.trace_stop"() : () -> ()
    %105 = tpu.reciprocal %102 {approx = true} : vector<1x8x1xf32> -> vector<1x8x1xf32>
    %106 = vector.broadcast %105 : vector<1x8x1xf32> to vector<1x8x8xf32>
    %107 = arith.mulf %104, %106 : vector<1x8x8xf32>
    %108 = tpu.concatenate %44, %65, %86, %107 in 2 : vector<1x8x8xf32>, vector<1x8x8xf32>, vector<1x8x8xf32>, vector<1x8x8xf32> -> vector<1x8x32xf32>
    %109 = vector.shape_cast %108 : vector<1x8x32xf32> to vector<8x32xf32>
    %110 = arith.truncf %109 : vector<8x32xf32> to vector<8x32xbf16>
    %c0_27 = arith.constant 0 : index
    %c0_28 = arith.constant 0 : index
    %c0_29 = arith.constant 0 : index
    %111 = vector.load %arg4[%c0_27, %c0_28, %c0_29] : memref<1x32x32xbf16, #tpu.memory_space<vmem>>, vector<1x32x32xbf16>
    %112 = vector.shape_cast %111 : vector<1x32x32xbf16> to vector<32x32xbf16>
    %cst_30 = arith.constant dense<0.000000e+00> : vector<8x32xf32>
    %113 = tpu.matmul %110, %112, %cst_30 {dimension_numbers = #tpu.dot_dimension_numbers<[1], [0], [0], [1], [0, 0, 1, 1], [], []>} : vector<8x32xbf16>, vector<32x32xbf16>, vector<8x32xf32> -> vector<8x32xf32>
    %114 = vector.broadcast %8 : vector<1x32xf32> to vector<8x32xf32>
    %115 = arith.addf %113, %114 : vector<8x32xf32>
    %116 = arith.addf %16, %115 : vector<8x32xf32>
    %cst_31 = arith.constant dense<0.000000e+00> : vector<8xf32>
    %117 = vector.multi_reduction <add>, %116, %cst_31 [1] : vector<8x32xf32> to vector<8xf32>
    %118 = vector.shape_cast %117 : vector<8xf32> to vector<8x1xf32>
    %cst_32 = arith.constant 3.200000e+01 : f32
    %119 = vector.broadcast %cst_32 : f32 to vector<8x1xf32>
    %120 = arith.divf %118, %119 : vector<8x1xf32>
    %121 = vector.broadcast %120 : vector<8x1xf32> to vector<8x32xf32>
    %122 = arith.subf %116, %121 : vector<8x32xf32>
    %123 = arith.mulf %122, %122 : vector<8x32xf32>
    %cst_33 = arith.constant dense<0.000000e+00> : vector<8xf32>
    %124 = vector.multi_reduction <add>, %123, %cst_33 [1] : vector<8x32xf32> to vector<8xf32>
    %125 = vector.shape_cast %124 : vector<8xf32> to vector<8x1xf32>
    %cst_34 = arith.constant 3.200000e+01 : f32
    %126 = vector.broadcast %cst_34 : f32 to vector<8x1xf32>
    %127 = arith.divf %125, %126 : vector<8x1xf32>
    %128 = vector.broadcast %120 : vector<8x1xf32> to vector<8x32xf32>
    %129 = arith.subf %116, %128 : vector<8x32xf32>
    %cst_35 = arith.constant 9.99999974E-6 : f32
    %130 = vector.broadcast %cst_35 : f32 to vector<8x1xf32>
    %131 = arith.addf %127, %130 : vector<8x1xf32>
    %132 = math.rsqrt %131 : vector<8x1xf32>
    %133 = vector.broadcast %132 : vector<8x1xf32> to vector<8x32xf32>
    %134 = arith.mulf %129, %133 : vector<8x32xf32>
    %135 = vector.broadcast %9 : vector<1x32xf32> to vector<8x32xf32>
    %136 = arith.mulf %134, %135 : vector<8x32xf32>
    %137 = vector.broadcast %10 : vector<1x32xf32> to vector<8x32xf32>
    %138 = arith.addf %136, %137 : vector<8x32xf32>
    %139 = arith.truncf %138 : vector<8x32xf32> to vector<8x32xbf16>
    %c0_36 = arith.constant 0 : index
    %c0_37 = arith.constant 0 : index
    %c0_38 = arith.constant 0 : index
    %140 = vector.load %arg5[%c0_36, %c0_37, %c0_38] : memref<1x32x2048xbf16, #tpu.memory_space<vmem>>, vector<1x32x2048xbf16>
    %141 = vector.shape_cast %140 : vector<1x32x2048xbf16> to vector<32x2048xbf16>
    %cst_39 = arith.constant dense<0.000000e+00> : vector<8x2048xf32>
    %142 = tpu.matmul %139, %141, %cst_39 {dimension_numbers = #tpu.dot_dimension_numbers<[1], [0], [0], [1], [0, 0, 1, 1], [], []>} : vector<8x32xbf16>, vector<32x2048xbf16>, vector<8x2048xf32> -> vector<8x2048xf32>
    %143 = vector.broadcast %11 : vector<1x2048xf32> to vector<8x2048xf32>
    %144 = arith.addf %142, %143 : vector<8x2048xf32>
    %cst_40 = arith.constant 0.000000e+00 : f32
    %145 = vector.broadcast %cst_40 : f32 to vector<8x2048xf32>
    %146 = arith.maximumf %144, %145 : vector<8x2048xf32>
    %147 = arith.truncf %146 : vector<8x2048xf32> to vector<8x2048xbf16>
    %c0_41 = arith.constant 0 : index
    %c0_42 = arith.constant 0 : index
    %c0_43 = arith.constant 0 : index
    %148 = vector.load %arg6[%c0_41, %c0_42, %c0_43] : memref<1x2048x32xbf16, #tpu.memory_space<vmem>>, vector<1x2048x32xbf16>
    %149 = vector.shape_cast %148 : vector<1x2048x32xbf16> to vector<2048x32xbf16>
    %cst_44 = arith.constant dense<0.000000e+00> : vector<8x32xf32>
    %150 = tpu.matmul %147, %149, %cst_44 {dimension_numbers = #tpu.dot_dimension_numbers<[1], [0], [0], [1], [0, 0, 1, 1], [], []>} : vector<8x2048xbf16>, vector<2048x32xbf16>, vector<8x32xf32> -> vector<8x32xf32>
    %151 = vector.broadcast %12 : vector<1x32xf32> to vector<8x32xf32>
    %152 = arith.addf %150, %151 : vector<8x32xf32>
    %153 = arith.addf %138, %152 : vector<8x32xf32>
    %cst_45 = arith.constant dense<0.000000e+00> : vector<8xf32>
    %154 = vector.multi_reduction <add>, %153, %cst_45 [1] : vector<8x32xf32> to vector<8xf32>
    %155 = vector.shape_cast %154 : vector<8xf32> to vector<8x1xf32>
    %cst_46 = arith.constant 3.200000e+01 : f32
    %156 = vector.broadcast %cst_46 : f32 to vector<8x1xf32>
    %157 = arith.divf %155, %156 : vector<8x1xf32>
    %158 = vector.broadcast %157 : vector<8x1xf32> to vector<8x32xf32>
    %159 = arith.subf %153, %158 : vector<8x32xf32>
    %160 = arith.mulf %159, %159 : vector<8x32xf32>
    %cst_47 = arith.constant dense<0.000000e+00> : vector<8xf32>
    %161 = vector.multi_reduction <add>, %160, %cst_47 [1] : vector<8x32xf32> to vector<8xf32>
    %162 = vector.shape_cast %161 : vector<8xf32> to vector<8x1xf32>
    %cst_48 = arith.constant 3.200000e+01 : f32
    %163 = vector.broadcast %cst_48 : f32 to vector<8x1xf32>
    %164 = arith.divf %162, %163 : vector<8x1xf32>
    %165 = vector.broadcast %157 : vector<8x1xf32> to vector<8x32xf32>
    %166 = arith.subf %153, %165 : vector<8x32xf32>
    %cst_49 = arith.constant 9.99999974E-6 : f32
    %167 = vector.broadcast %cst_49 : f32 to vector<8x1xf32>
    %168 = arith.addf %164, %167 : vector<8x1xf32>
    %169 = math.rsqrt %168 : vector<8x1xf32>
    %170 = vector.broadcast %169 : vector<8x1xf32> to vector<8x32xf32>
    %171 = arith.mulf %166, %170 : vector<8x32xf32>
    %172 = vector.broadcast %13 : vector<1x32xf32> to vector<8x32xf32>
    %173 = arith.mulf %171, %172 : vector<8x32xf32>
    %174 = vector.broadcast %14 : vector<1x32xf32> to vector<8x32xf32>
    %175 = arith.addf %173, %174 : vector<8x32xf32>
    %176 = vector.shape_cast %175 : vector<8x32xf32> to vector<1x8x32xf32>
    %c0_50 = arith.constant 0 : index
    %c0_51 = arith.constant 0 : index
    %c0_52 = arith.constant 0 : index
    %177 = vector.load %arg8[%c0_50, %c0_51, %c0_52] : memref<1x8x32xf32, #tpu.memory_space<vmem>>, vector<1x8x32xf32>
    tpu.vector_store %arg8[%c0_50, %c0_51, %c0_52], %176 {strides = array<i32>} : memref<1x8x32xf32, #tpu.memory_space<vmem>>, vector<1x8x32xf32>,
    return
  }
  func.func @transform_0(%arg0: i32, %arg1: i32) -> (i32, i32, i32) {
    %c0_i32 = arith.constant 0 : i32
    %c0_i32_0 = arith.constant 0 : i32
    %c0_i32_1 = arith.constant 0 : i32
    return %arg0, %c0_i32, %c0_i32_0 : i32, i32, i32
  }
  func.func @transform_1(%arg0: i32, %arg1: i32) -> (i32, i32, i32) {
    %c0_i32 = arith.constant 0 : i32
    %c0_i32_0 = arith.constant 0 : i32
    %c0_i32_1 = arith.constant 0 : i32
    return %arg1, %c0_i32, %c0_i32_0 : i32, i32, i32
  }
  func.func @transform_2(%arg0: i32, %arg1: i32) -> (i32, i32, i32) {
    %c0_i32 = arith.constant 0 : i32
    %c0_i32_0 = arith.constant 0 : i32
    %c0_i32_1 = arith.constant 0 : i32
    return %arg1, %c0_i32, %c0_i32_0 : i32, i32, i32
  }
  func.func @transform_3(%arg0: i32, %arg1: i32) -> (i32, i32, i32) {
    %c0_i32 = arith.constant 0 : i32
    %c0_i32_0 = arith.constant 0 : i32
    %c0_i32_1 = arith.constant 0 : i32
    return %arg1, %c0_i32, %c0_i32_0 : i32, i32, i32
  }
  func.func @transform_4(%arg0: i32, %arg1: i32) -> (i32, i32, i32) {
    %c0_i32 = arith.constant 0 : i32
    %c0_i32_0 = arith.constant 0 : i32
    %c0_i32_1 = arith.constant 0 : i32
    return %arg1, %c0_i32, %c0_i32_0 : i32, i32, i32
  }
  func.func @transform_5(%arg0: i32, %arg1: i32) -> (i32, i32, i32) {
    %c0_i32 = arith.constant 0 : i32
    %c0_i32_0 = arith.constant 0 : i32
    %c0_i32_1 = arith.constant 0 : i32
    return %arg1, %c0_i32, %c0_i32_0 : i32, i32, i32
  }
  func.func @transform_6(%arg0: i32, %arg1: i32) -> (i32, i32, i32) {
    %c0_i32 = arith.constant 0 : i32
    %c0_i32_0 = arith.constant 0 : i32
    %c0_i32_1 = arith.constant 0 : i32
    return %arg0, %c0_i32, %c0_i32_0 : i32, i32, i32
  }
}

</mosaic_0001>

<bundles_post_ra>
// kernel: tpu_custom_call.1
= control target key start
LH: loop header
LB: loop body
LE: loop exit
PB: predicated region body
PF: predicated region fallthrough
CT: control target
= control target key end

     0   :  { %s4519_s0 = inlined_call_operand.vmem [shape: f32[2,8,32], index: 0, kind: input, shape index: {}]   ;;  %s4520_s1 = inlined_call_operand.vmem [shape: bf16[2,32,96], index: 1, kind: input, shape index: {}]   ;;  %s4521_s2 = inlined_call_operand.vmem [shape: bf16[2,32,32], index: 2, kind: input, shape index: {}]   ;;  %s4522_s3 = inlined_call_operand.vmem [shape: bf16[2,32,2048], index: 3, kind: input, shape index: {}]   ;;  %s4523_s4 = inlined_call_operand.vmem [shape: bf16[2,2048,32], index: 4, kind: input, shape index: {}]   ;;  %s4524_s5 = inlined_call_operand.vmem [shape: f32[2,8,2048], index: 5, kind: input, shape index: {}]   ;;  %s4525_s6 = inlined_call_operand.hbm [shape: f32[2,8,32], index: 6, kind: output, shape index: {}]  }
   0x1   :  { %4533 = sst [smem:[#allocation13_spill]] %s4519_s0 }
   0x2   :  { %11 = vsyncpa [#allocation3], 0 }
   0x3   :  { %13 = vsyncpa [#allocation3 + $0x1], 0  ;;  %s3998_s21 = smov 0   ;;  %s4000_s22 = smov 0  }
   0x4   :  { %s4002_s23 = smov 0   ;;  %s4004_s24 = smov 0  }
   0x5   :  { %s4006_s25 = smov 0   ;;  %s4008_s26 = smov 0  }
   0x6   :  { %s4010_s27 = smov 0   ;;  %s4012_s28 = smov 0  }
   0x7 LB: > { %4534 = sst [smem:[#allocation5_spill]] %s3915_s21  ;;  %s3137_s29 = sadd.s32 4294967295, %s3943_s28   ;;  %s3943_s28 = sphi %s4012_s28, %s19_s28   ;;  %s3939_s27 = sphi %s4010_s27, %s4553_s27   ;;  %s3935_s26 = sphi %s4008_s26, %s4552_s26   ;;  %s3931_s25 = sphi %s4006_s25, %s4551_s25   ;;  %s3927_s24 = sphi %s4004_s24, %s4550_s24   ;;  %s3923_s23 = sphi %s4002_s23, %s4549_s23   ;;  %s3919_s22 = sphi %s4000_s22, %s4555_s22   ;;  %s3915_s21 = sphi %s3998_s21, %s4554_s21  }
   0x8   : > { %4535 = sst [smem:[#allocation6_spill]] %s3923_s23  ;;  %s3138_s30 = sadd.s32 4294967294, %s3943_s28  }
   0x9   : > { %4536 = sst [smem:[#allocation7_spill]] %s3935_s26  ;;  %s28_s7 = sadd.s32 1, %s3935_s26 }
   0xa   : > { %4537 = sst [smem:[#allocation8_spill]] %s3939_s27  ;;  %p29_p0 = scmp.ge.s32.totalorder %s28_s7, 2 }
   0xb   : > { %s31_s8 = sadd.s32 1, %s3939_s27  ;;  %p204_p1 = scmp.ne.s32.totalorder %s3923_s23, %s3919_s22 }
   0xc   : > { %p205_p2 = scmp.eq.s32.totalorder %s3137_s29, 3  ;;  %s4557_s7 = smov (%p29_p0, %s28_s7), 0 }
   0xd   : > { %4538 = sst [smem:[#allocation9_spill]] %s4557_s7  ;;  %s4559_s8 = smov (!%p29_p0, %s31_s8), %s3939_s27 }
   0xe   : > { %p4047_p3 = por %p205_p2, %p204_p1  ;;  %p210_p4 = scmp.ne.s32.totalorder %s3919_s22, %s3915_s21 }
   0xf   : > { %p33_p5 = scmp.ge.s32.totalorder %s4559_s8, 2  ;;  %p211_p6 = scmp.eq.s32.totalorder %s3138_s30, 3 }
  0x10   : > { %p3141_p7 = scmp.ge.s32.totalorder %s3943_s28, 1  ;;  %p276_p8 = scmp.lt.s32.totalorder %s3943_s28, 5 }
  0x11   : > { %s4561_s8 = smov (%p33_p5, %s4559_s8), 0  ;;  %p4057_p9 = por %p211_p6, %p210_p4 }
  0x12   : > { %4540 = sst [smem:[#allocation10_spill]] %s4561_s8  ;;  %p277_p10 = pnand %p3141_p7, %p276_p8 }
  0x13   : > { %s4541_s10 = scalar_select %p4057_p9, 1, 0 }
  0x14   : > { %s191_s11 = ssub.s32 %s3939_s27, %s4561_s8  ;;  %s194_s12 = sadd.s32 1, %s3923_s23 }
  0x15   : > { %4542 = sst [smem:[#allocation11_spill]] %s4541_s10  ;;  %p192_p11 = scmp.eq.s32.totalorder %s191_s11, 0 }
  0x16   : > { %280 = sbr.rel (%p277_p10) target bundleno = 2538 (0x9ea), region = 44  ;;  %s4529_s14 = sand.u32 (!%p277_p10), 1, %s3919_s22  }
  0x17   : > { %s4065_s13 = scalar_select %p192_p11, %s3923_s23, %s194_s12  }
  0x18   : > { %p330_p12 = scmp.lt.s32.totalorder (!%p277_p10), %s3931_s25, 1  ;;  %s3142_s15 = sshll.u32 (!%p277_p10), %s4529_s14, 3 }
  0x19   : > { %4543 = sst [smem:[#allocation12_spill]] %s4065_s13  ;;  %p334_p13 = scmp.lt.s32.totalorder (!%p277_p10), %s3927_s24, 1 }
  0x1a   : > { %s4544_s0 = sld [smem:[#allocation13_spill]] (!%p277_p10)  ;;  %s4100_s27 = scalar_lea.vmem (!%p277_p10), [#allocation2], %s3142_s15 }
  0x1b   : > { %p3154_p0 = scmp.ne.s32.totalorder (!%p277_p10), %s3927_s24, 0 }
  0x1d   : > { %s331_s16 = scalar_select %p330_p12, %s3931_s25, 1 }
  0x1e   : > { %s335_s17 = scalar_select %p334_p13, %s3927_s24, 1 }
  0x1f   : > { %s3143_s18 = sshll.u32 %s331_s16, 3  ;;  %363 = sbr.rel (%p3154_p0) target bundleno = 38 (0x26), region = 48  ;;  %vm365_vm0 = vcmask (!%p3154_p0), 261120  }
  0x20   : > { %s333_s29 = scalar_lea.vmem %s4544_s0, %s3143_s18  ;;  %s3341_s30 = sshll.u32 %s335_s17, 4 }
  0x21   : > { %s338_s8 = scalar_lea.vmem %s4520_s1, %s3341_s30  ;;  %s4083_s26 = scalar_lea.vmem %s4521_s2, %s3341_s30  ;;  %v364_v0 = vld [vmem:[%s333_s29] sm:$0xff] (!%p3154_p0) }
  0x22   : > { %s3343_s13 = sshll.u32 %s335_s17, 8  ;;  %s3344_s14 = sshll.u32 %s335_s17, 10  ;;  %366 = vst.msk [vmem:[%s4100_s27] sm:$0xff] (!%p3154_p0), %vm365_vm0, %v364_v0 }
  0x23   : > { %s4088_s16 = scalar_lea.vmem %s4522_s3, %s3343_s13  ;;  %s4093_s18 = scalar_lea.vmem %s4523_s4, %s3344_s14 }
  0x24   : > { %s3345_s20 = sshll.u32 %s335_s17, 7 }
  0x25   : > { %s4098_s0 = scalar_lea.vmem %s4524_s5, %s3345_s20 }
  0x26 PF: > { %v3696_v1 = vld [vmem:[%s338_s8] sm:$0xff]   ;;  %v3945_v2 = vmov 0.0   ;;  %v3697_v3 = vld [vmem:[%s338_s8 + $0x8] sm:$0xff]   ;;  %vm3946_vm1 = vmmov 0   ;;  %vm405_vm2 = vcmask 261120   ;;  %v389_v6 = vlaneseq  ;;  %s3947_s21 = smov 96  }
  0x27   : > { %3544 = vmatprep.subr.bf16.mxu0 %v3945_v2  ;;  %3552 = vmatprep.subr.bf16.mxu1 %v3945_v2  ;;  %v4124_v9 = vld [vmem:[%s4098_s0] sm:$0xff]  ;;  %s3948_s23 = smov 120   ;;  %s3949_s24 = smov 88   ;;  %vm455_vm3 = vcmask 64512   ;;  %vm517_vm4 = vcmask 1043456   ;;  %vm907_vm5 = vcmask 130048  }
  0x28   : > { %3545 = vmatpush3.bf16.msra.mxu0 %v3696_v1  ;;  %3548 = vmatprep.mubr.msk.bf16.mxu0 %vm3946_vm1, %v3945_v2  ;;  %v4120_v7 = vshrl.u32 %v389_v6, 7  ;;  %s3950_s7 = smov 80   ;;  %s3951_s8 = smov 112   ;;  %vm909_vm6 = vcmask 195584  }
  0x29   : > { %v4109_v4 = vld [vmem:[%s4100_s27] sm:$0xff]  ;;  %3546 = vmatprep.subr.bf16.mxu0 %v3945_v2  ;;  %3554 = vmatprep.mubr.msk.bf16.mxu1 %vm3946_vm1, %v3945_v2  ;;  %s3952_s10 = smov 72   ;;  %s3953_s13 = smov 104  }
  0x2a   : > { %v384_v5 = vpack.c.bf16 %v4109_v4, %v4109_v4  ;;  %v391_v8 = vsub.s32 0, %v4120_v7  ;;  %s3954_s14 = smov 56   ;;  %s3955_s15 = smov 64  }
  0x2b   : > { %s3956_s17 = smov 40   ;;  %s3957_s29 = smov 48  }
  0x2c   : > { %3547 = vmatpush3.bf16.msra.mxu0 %v3697_v3  ;;  %v392_v10 = vrot.slane %v4124_v9, %v391_v8  ;;  %s3958_s30 = smov 8   ;;  %s3959_s19 = smov 16  }
  0x2d   : > { %3558 = vmatprep.subr.bf16.mxu0 %v3945_v2  ;;  %s3960_s20 = smov 24   ;;  %s4545_s12 = sand.u32 1, %s3919_s22  }
  0x2f   : > { %3549 = vmatmul.mubr.msk.bf16.vlgmr.msra.gmra.mrb[0].mxu0 %vm405_vm2, %v384_v5 }
  0x30   : > { %3560 = vmatprep.mubr.msk.bf16.mxu0 %vm3946_vm1, %v3945_v2 }
 0x102   : > { %v443_v11 = vpop.f32.mrb[0].mxu0 }
 0x103   : > { %v444_v12 = vadd.f32 %v443_v11, %v392_v10  ;;  %v3550_v13 = vpop.f32.mrb[1].mxu0 }
 0x104   : > { %v446_v14 = vpop.f32.mrb[2].mxu0 }
 0x105   : > { %v449_v15 = vmul.f32 0.35355338, %v444_v12  ;;  %v4127_v16 = vpack.c.bf16 %v444_v12, %v444_v12  ;;  %v3551_v17 = vpop.f32.mrb[3].mxu0 }
 0x107   : > { %v450_v18 = vpack.c.bf16 %v449_v15, %v449_v15  ;;  %453 = vrot.lane.b32.xlu0 %v4127_v16, %s3947_s21  ;;  %s2994_s21 = scalar_lea.sflag [#allocation3], %s4545_s12 }
 0x109   : > { %564 = vrot.lane.b32.xlu1 %v450_v18, %s3948_s23 }
 0x10b   : > { %566 = vrot.lane.b32.xlu0 %v4127_v16, %s3949_s24 }
 0x10d   : > { %676 = vrot.lane.b32.xlu1 %v4127_v16, %s3950_s7 }
 0x10f   : > { %674 = vrot.lane.b32.xlu0 %v450_v18, %s3951_s8 }
 0x111   : > { %786 = vrot.lane.b32.xlu1 %v4127_v16, %s3952_s10 }
 0x113   : > { %784 = vrot.lane.b32.xlu0 %v450_v18, %s3953_s13 }
 0x179   : > { %v454_v19 = vpop.permute.xlu0 %453 }
 0x17a   : > { %v460_v20 = vsel %vm455_vm3, %v454_v19, 0 }
 0x17b   : > { %3553 = vmatpush3.bf16.xpose.msra.mxu1 %v460_v20  ;;  %v565_v22 = vpop.permute.xlu1 %564 }
 0x17c   : > { %3564 = vmatprep.subr.bf16.mxu1 %v3945_v2 }
 0x17d   : > { %v567_v21 = vpop.permute.xlu0 %566 }
 0x17e   : > { %v572_v23 = vsel %vm455_vm3, %v567_v21, 0 }
 0x17f   : > { %v677_v24 = vpop.permute.xlu1 %676 }
 0x180   : > { %v682_v25 = vsel %vm455_vm3, %v677_v24, 0 }
 0x181   : > { %v675_v27 = vpop.permute.xlu0 %674 }
 0x182   : > { %3555 = vmatmul.mubr.msk.bf16.vlgmr.msra.gmra.mrb[0].mxu1 %vm455_vm3, %v450_v18 }
 0x183   : > { %3565 = vmatpush3.bf16.xpose.msra.mxu1 %v572_v23  ;;  %3566 = vmatprep.mubr.msk.bf16.mxu1 %vm3946_vm1, %v3945_v2  ;;  %v787_v26 = vpop.permute.xlu1 %786 }
 0x184   : > { %3576 = vmatprep.subr.bf16.mxu1 %v3945_v2  ;;  %v792_v28 = vsel %vm455_vm3, %v787_v26, 0 }
 0x185   : > { %v785_v29 = vpop.permute.xlu0 %784 }
 0x18a   : > { %3567 = vmatmul.mubr.msk.bf16.vlgmr.msra.gmra.mrb[4].mxu1 %vm455_vm3, %v565_v22 }
 0x18b   : > { %3577 = vmatpush3.bf16.xpose.msra.mxu1 %v682_v25  ;;  %3578 = vmatprep.mubr.msk.bf16.mxu1 %vm3946_vm1, %v3945_v2 }
 0x18c   : > { %3588 = vmatprep.subr.bf16.mxu1 %v3945_v2 }
 0x192   : > { %3579 = vmatmul.mubr.msk.bf16.vlgmr.msra.gmra.mrb[8].mxu1 %vm455_vm3, %v675_v27 }
 0x193   : > { %3589 = vmatpush3.bf16.xpose.msra.mxu1 %v792_v28  ;;  %3590 = vmatprep.mubr.msk.bf16.mxu1 %vm3946_vm1, %v3945_v2 }
 0x194   : > { %3600 = vmatprep.subr.bf16.mxu1 %v3945_v2 }
 0x19a   : > { %3591 = vmatmul.mubr.msk.bf16.vlgmr.msra.gmra.mrb[12].mxu1 %vm455_vm3, %v785_v29 }
 0x19b   : > { %3604 = vmatprep.mubr.msk.bf16.mxu1 %vm3946_vm1, %v3945_v2 }
 0x255   : > { %v496_v30 = vpop.f32.mrb[0].mxu1 }
 0x256   : > { %v3556_v31 = vpop.f32.mrb[1].mxu1  ;;  %v502_v32 = vsel %vm455_vm3, %v496_v30, -inf }
 0x257   : > { %503 = vmax.xlane.f32.xlu1 %v502_v32  ;;  %v499_v33 = vpop.f32.mrb[2].mxu1 }
 0x258   : > { %v3557_v34 = vpop.f32.mrb[3].mxu1 }
 0x259   : > { %v3698_v34 = vld [vmem:[%s4083_s26] sm:$0xff]  }
 0x25a   : > { %3601 = vmatpush3.bf16.msra.mxu1 %v3698_v34 }
 0x25b   : > { %3602 = vmatprep.subr.bf16.mxu1 %v3945_v2 }
 0x25d   : > { %v608_v35 = vpop.f32.mrb[4].mxu1 }
 0x25e   : > { %v3568_v36 = vpop.f32.mrb[5].mxu1  ;;  %v614_v37 = vsel %vm455_vm3, %v608_v35, -inf }
 0x25f   : > { %615 = vmax.xlane.f32.xlu0 %v614_v37  ;;  %v611_v38 = vpop.f32.mrb[6].mxu1  ;;  %v3699_v36 = vld [vmem:[%s4083_s26 + $0x8] sm:$0xff]   ;;  %s3007_s26 = sshll.u32 %s4100_s27, 4  ;;  %s4464_s26 = int_to_ptr.vmem [resolvable:$true] %s3007_s26 }
 0x260   : > { %v3569_v39 = vpop.f32.mrb[7].mxu1  ;;  %3603 = vmatpush3.bf16.msra.mxu1 %v3699_v36  ;;  %s3849_s23 = scalar_lea.vmem %s4464_s26, 128 }
 0x261   : > { %p3850_p1 = scmp.ne.s32.totalorder %s4464_s26, %s3849_s23 }
 0x263   : > { %p3851_p2 = pnand %p3850_p1, %p4047_p3 }
 0x265   : > { %v718_v40 = vpop.f32.mrb[8].mxu1  ;;  %p3852_p4 = pneg %p3851_p2 }
 0x266   : > { %v3580_v41 = vpop.f32.mrb[9].mxu1  ;;  %v724_v42 = vsel %vm455_vm3, %v718_v40, -inf }
 0x267   : > { %725 = vmax.xlane.f32.xlu0 %v724_v42  ;;  %v721_v43 = vpop.f32.mrb[10].mxu1 }
 0x268   : > { %624 = vrot.lane.b32.xlu1 %v4127_v16, %s3954_s14  ;;  %v3581_v44 = vpop.f32.mrb[11].mxu1 }
 0x26d   : > { %v828_v45 = vpop.f32.mrb[12].mxu1 }
 0x26e   : > { %v3592_v46 = vpop.f32.mrb[13].mxu1  ;;  %v834_v49 = vsel %vm455_vm3, %v828_v45, -inf }
 0x26f   : > { %v831_v47 = vpop.f32.mrb[14].mxu1 }
 0x270   : > { %v3593_v48 = vpop.f32.mrb[15].mxu1 }
 0x27d   : > { %512 = vrot.lane.b32.xlu0 %v4127_v16, %s3955_s15 }
 0x281   : > { %844 = vrot.lane.b32.xlu0 %v4127_v16, %s3956_s17 }
 0x28c   : > { %835 = vmax.xlane.f32.xlu1 %v834_v49 }
 0x29d   : > { %734 = vrot.lane.b32.xlu1 %v4127_v16, %s3957_s29 }
 0x2e4   : > { %v504_v50 = vpop.xlane.xlu1 %503 }
 0x2e5   : > { %v505_v51 = vsub.f32 %v496_v30, %v504_v50 }
 0x2e7   : > { %v506_v52 = vmul.f32 1.442695, %v505_v51 }
 0x2e8   : > { %v625_v62 = vpop.permute.xlu1 %624 }
 0x2e9   : > { %3828 = vpow2.f32 %v506_v52  ;;  %v630_v3 = vsel %vm517_vm4, %v625_v62, 0 }
 0x2ec   : > { %v616_v53 = vpop.xlane.xlu0 %615 }
 0x2ed   : > { %v617_v54 = vsub.f32 %v608_v35, %v616_v53 }
 0x2ef   : > { %v618_v55 = vmul.f32 1.442695, %v617_v54 }
 0x2f1   : > { %3830 = vpow2.f32 %v618_v55 }
 0x2f3   : > { %v3829_v59 = vpop.eup %3828 }
 0x2f4   : > { %v726_v56 = vpop.xlane.xlu0 %725  ;;  %v511_v0 = vpack.c.bf16 %v3829_v59, %v3829_v59  ;;  %v508_v5 = vsel %vm455_vm3, %v3829_v59, 0.0 }
 0x2f5   : > { %v727_v57 = vsub.f32 %v718_v40, %v726_v56 }
 0x2f7   : > { %v728_v58 = vmul.f32 1.442695, %v727_v57 }
 0x2f8   : > { %v513_v60 = vpop.permute.xlu0 %512 }
 0x2f9   : > { %3832 = vpow2.f32 %v728_v58  ;;  %v519_v61 = vsel %vm517_vm4, %v513_v60, 0  ;;  %v918_v58 = vsub.s32 1, %v4120_v7 }
 0x2fa   : > { %3559 = vmatpush3.bf16.msra.mxu0 %v519_v61 }
 0x2fb   : > { %v3831_v63 = vpop.eup %3830  ;;  %3570 = vmatprep.subr.bf16.mxu0 %v3945_v2  ;;  %v919_v59 = vrot.slane %v4124_v9, %v918_v58 }
 0x2fc   : > { %v620_v1 = vsel %vm455_vm3, %v3831_v63, 0.0  ;;  %v623_v8 = vpack.c.bf16 %v3831_v63, %v3831_v63  ;;  %v845_v16 = vpop.permute.xlu0 %844 }
 0x2fd   : > { %3561 = vmatmul.mubr.msk.bf16.vlgmr.msra.gmra.mrb[4].mxu0 %vm455_vm3, %v511_v0  ;;  %621 = vadd.xlane.f32.xlu1 %v620_v1  ;;  %v850_v18 = vsel %vm517_vm4, %v845_v16, 0  ;;  %v1010_v16 = vld [vmem:[%s4088_s16 + $0x48] sm:$0xff] }
 0x2fe   : > { %3571 = vmatpush3.bf16.msra.mxu0 %v630_v3  ;;  %3572 = vmatprep.mubr.msk.bf16.mxu0 %vm3946_vm1, %v3945_v2 }
 0x2ff   : > { %3582 = vmatprep.subr.bf16.mxu0 %v3945_v2 }
 0x301   : > { %509 = vadd.xlane.f32.xlu1 %v508_v5 }
 0x303   : > { %v3833_v6 = vpop.eup %3832 }
 0x304   : > { %v730_v10 = vsel %vm455_vm3, %v3833_v6, 0.0  ;;  %v733_v17 = vpack.c.bf16 %v3833_v6, %v3833_v6 }
 0x305   : > { %731 = vadd.xlane.f32.xlu0 %v730_v10  ;;  %3573 = vmatmul.mubr.msk.bf16.vlgmr.msra.gmra.mrb[8].mxu0 %vm455_vm3, %v623_v8 }
 0x306   : > { %3584 = vmatprep.mubr.msk.bf16.mxu0 %vm3946_vm1, %v3945_v2 }
 0x319   : > { %v836_v11 = vpop.xlane.xlu1 %835 }
 0x31a   : > { %v837_v12 = vsub.f32 %v828_v45, %v836_v11 }
 0x31c   : > { %v838_v13 = vmul.f32 1.442695, %v837_v12  ;;  %v1001_v12 = vld [vmem:[%s4088_s16] sm:$0xff] }
 0x31d   : > { %v735_v14 = vpop.permute.xlu1 %734 }
 0x31e   : > { %3834 = vpow2.f32 %v838_v13  ;;  %v740_v15 = vsel %vm517_vm4, %v735_v14, 0  ;;  %v1009_v13 = vld [vmem:[%s4088_s16 + $0x40] sm:$0xff]  ;;  %v1002_v14 = vld [vmem:[%s4088_s16 + $0x8] sm:$0xff] }
 0x31f   : > { %3583 = vmatpush3.bf16.msra.mxu0 %v740_v15  ;;  %v3170_v15 = vcombine.high %v1001_v12, %v1009_v13 }
 0x320   : > { %3594 = vmatprep.subr.bf16.mxu0 %v3945_v2 }
 0x322   : > { %3585 = vmatmul.mubr.msk.bf16.vlgmr.msra.gmra.mrb[12].mxu0 %vm455_vm3, %v733_v17  ;;  %v3171_v17 = vcombine.low %v1002_v14, %v1010_v16 }
 0x323   : > { %3595 = vmatpush3.bf16.msra.mxu0 %v850_v18  ;;  %3596 = vmatprep.mubr.msk.bf16.mxu0 %vm3946_vm1, %v3945_v2  ;;  %v3172_v18 = vcombine.high %v1002_v14, %v1010_v16 }
 0x324   : > { %1260 = vmatprep.subr.bf16.mxu0 %v3170_v15 }
 0x325   : > { %1301 = vmatprep.subr.bf16.mxu1 %v3172_v18  ;;  %v1024_v18 = vld [vmem:[%s4088_s16 + $0xb8] sm:$0xff] }
 0x328   : > { %v3835_v19 = vpop.eup %3834 }
 0x329   : > { %v840_v20 = vsel %vm455_vm3, %v3835_v19, 0.0  ;;  %v843_v21 = vpack.c.bf16 %v3835_v19, %v3835_v19  ;;  %v1017_v19 = vld [vmem:[%s4088_s16 + $0x80] sm:$0xff] }
 0x32a   : > { %841 = vadd.xlane.f32.xlu0 %v840_v20  ;;  %v1025_v20 = vld [vmem:[%s4088_s16 + $0xc0] sm:$0xff] }
 0x32b   : > { %3597 = vmatmul.mubr.msk.bf16.vlgmr.msra.gmra.mrb[16].mxu0 %vm455_vm3, %v843_v21  ;;  %v1018_v21 = vld [vmem:[%s4088_s16 + $0x88] sm:$0xff] }
 0x38a   : > { %v622_v22 = vpop.xlane.xlu1 %621 }
 0x38b   : > { %3836 = vrcp.f32 %v622_v22  ;;  %v3186_v22 = vcombine.high %v1017_v19, %v1025_v20 }
 0x38e   : > { %v510_v48 = vpop.xlane.xlu1 %509 }
 0x392   : > { %v732_v33 = vpop.xlane.xlu0 %731 }
 0x393   : > { %3838 = vrcp.f32 %v732_v33 }
 0x395   : > { %v3837_v27 = vpop.eup %3836 }
 0x39d   : > { %v3839_v37 = vpop.eup %3838 }
 0x3b7   : > { %v842_v35 = vpop.xlane.xlu0 %841 }
 0x3b8   : > { %3840 = vrcp.f32 %v842_v35 }
 0x3b9   : > { %3842 = vrcp.f32 %v510_v48  ;;  %v1028_v48 = vld [vmem:[%s4088_s16 + $0xd8] sm:$0xff] }
 0x3c2   : > { %v3841_v43 = vpop.eup %3840 }
 0x3c3   : > { %v3843_v49 = vpop.eup %3842 }
 0x3d0   : > { %v555_v23 = vpop.f32.mrb[4].mxu0 }
 0x3d1   : > { %v3562_v24 = vpop.f32.mrb[5].mxu0  ;;  %v562_v52 = vmul.f32 %v3843_v49, %v555_v23  ;;  %v1026_v23 = vld [vmem:[%s4088_s16 + $0xc8] sm:$0xff] }
 0x3d2   : > { %v558_v25 = vpop.f32.mrb[6].mxu0  ;;  %v3185_v24 = vcombine.low %v1017_v19, %v1025_v20  ;;  %v1032_v19 = vld [vmem:[%s4088_s16 + $0xf8] sm:$0xff] }
 0x3d3   : > { %v3563_v26 = vpop.f32.mrb[7].mxu0  ;;  %v3187_v25 = vcombine.low %v1018_v21, %v1026_v23 }
 0x3d4   : > { %v3188_v26 = vcombine.high %v1018_v21, %v1026_v23  ;;  %v3200_v23 = vcombine.high %v1024_v18, %v1032_v19 }
 0x3d8   : > { %v666_v28 = vpop.f32.mrb[8].mxu0 }
 0x3d9   : > { %v673_v29 = vmul.f32 %v3837_v27, %v666_v28  ;;  %v3574_v30 = vpop.f32.mrb[9].mxu0  ;;  %v1003_v27 = vld [vmem:[%s4088_s16 + $0x10] sm:$0xff] }
 0x3da   : > { %v669_v31 = vpop.f32.mrb[10].mxu0  ;;  %v1011_v28 = vld [vmem:[%s4088_s16 + $0x50] sm:$0xff] }
 0x3db   : > { %v3575_v32 = vpop.f32.mrb[11].mxu0  ;;  %895 = vrot.lane.b32.xlu0 %v673_v29, %s3958_s30  ;;  %v1004_v29 = vld [vmem:[%s4088_s16 + $0x18] sm:$0xff]  ;;  %v3174_v30 = vcombine.high %v1003_v27, %v1011_v28  ;;  %v3173_v33 = vcombine.low %v1003_v27, %v1011_v28  ;;  %v3701_v27 = vld [vmem:[%s4093_s18 + $0xc0] sm:$0xff]  }
 0x3dc   : > { %v1012_v31 = vld [vmem:[%s4088_s16 + $0x58] sm:$0xff]  ;;  %v3961_v32 = vmov 0   ;;  %v3702_v28 = vld [vmem:[%s4093_s18] sm:$0xff]  }
 0x3dd   : > { %1292 = vmatprep.mubr.bf16.mxu0 %v3961_v32  ;;  %v3175_v34 = vcombine.low %v1004_v29, %v1012_v31  ;;  %v3176_v35 = vcombine.high %v1004_v29, %v1012_v31  ;;  %v3703_v29 = vld [vmem:[%s4093_s18 + $0x80] sm:$0xff]   ;;  %v3705_v31 = vld [vmem:[%s4093_s18 + $0xc8] sm:$0xff]  }
 0x3f5   : > { %v776_v38 = vpop.f32.mrb[12].mxu0 }
 0x3f6   : > { %v783_v39 = vmul.f32 %v3839_v37, %v776_v38  ;;  %v3586_v40 = vpop.f32.mrb[13].mxu0 }
 0x3f7   : > { %v779_v41 = vpop.f32.mrb[14].mxu0  ;;  %v997_v40 = vsub.s32 3, %v4120_v7 }
 0x3f8   : > { %899 = vrot.lane.b32.xlu1 %v783_v39, %s3959_s19  ;;  %v3587_v42 = vpop.f32.mrb[15].mxu0  ;;  %v992_v39 = vsub.s32 2, %v4120_v7 }
 0x3fa   : > { %v993_v41 = vrot.slane %v4124_v9, %v992_v39  ;;  %v3713_v39 = vld [vmem:[%s4093_s18 + $0xd8] sm:$0xff]  }
 0x3fe   : > { %v886_v44 = vpop.f32.mrb[16].mxu0 }
 0x3ff   : > { %v893_v45 = vmul.f32 %v3841_v43, %v886_v44  ;;  %v3598_v46 = vpop.f32.mrb[17].mxu0  ;;  %v998_v43 = vrot.slane %v4124_v9, %v997_v40  ;;  %v3714_v40 = vld [vmem:[%s4093_s18 + $0x18] sm:$0xff]  }
 0x400   : > { %v889_v47 = vpop.f32.mrb[18].mxu0  ;;  %v1019_v46 = vld [vmem:[%s4088_s16 + $0x90] sm:$0xff] }
 0x401   : > { %903 = vrot.lane.b32.xlu1 %v893_v45, %s3960_s20  ;;  %v3599_v2 = vpop.f32.mrb[19].mxu0  ;;  %v1027_v47 = vld [vmem:[%s4088_s16 + $0xd0] sm:$0xff] }
 0x402   : > { %v1020_v2 = vld [vmem:[%s4088_s16 + $0x98] sm:$0xff] }
 0x403   : > { %v3191_v58 = vcombine.low %v1020_v2, %v1028_v48 }
 0x44d   : > { %v896_v50 = vpop.permute.xlu0 %895 }
 0x44e   : > { %v906_v53 = vsel %vm455_vm3, %v562_v52, %v896_v50  ;;  %v3192_v52 = vcombine.high %v1020_v2, %v1028_v48  ;;  %v3722_v2 = vld [vmem:[%s4093_s18 + $0x28] sm:$0xff]  }
 0x44f   : > { %v3723_v48 = vld [vmem:[%s4093_s18 + $0xa8] sm:$0xff]  }
 0x46a   : > { %v900_v51 = vpop.permute.xlu1 %899 }
 0x46b   : > { %v908_v54 = vsel %vm907_vm5, %v906_v53, %v900_v51  ;;  %v3190_v51 = vcombine.high %v1019_v46, %v1027_v47  ;;  %v1005_v53 = vld [vmem:[%s4088_s16 + $0x20] sm:$0xff] }
 0x473   : > { %v904_v55 = vpop.permute.xlu1 %903 }
 0x474   : > { %v910_v56 = vsel %vm909_vm6, %v908_v54, %v904_v55  ;;  %v1013_v54 = vld [vmem:[%s4088_s16 + $0x60] sm:$0xff]  ;;  %v1006_v55 = vld [vmem:[%s4088_s16 + $0x28] sm:$0xff] }
 0x475   : > { %v911_v57 = vpack.c.bf16 %v910_v56, %v910_v56  ;;  %v1014_v56 = vld [vmem:[%s4088_s16 + $0x68] sm:$0xff] }
 0x477   : > { %3605 = vmatmul.mubr.msk.bf16.vlgmr.msra.gmra.mrb[16].mxu1 %vm405_vm2, %v911_v57  ;;  %v3189_v57 = vcombine.low %v1019_v46, %v1027_v47  ;;  %v3720_v46 = vld [vmem:[%s4093_s18 + $0x68] sm:$0xff]  }
 0x478   : > { %1302 = vmatpush1.bf16.msra.mxu1 %v3171_v17  ;;  %1333 = vmatprep.mubr.bf16.mxu1 %v3961_v32  ;;  %v1031_v17 = vld [vmem:[%s4088_s16 + $0xf0] sm:$0xff]  ;;  %v3721_v47 = vld [vmem:[%s4093_s18 + $0xe8] sm:$0xff]  }
 0x479   : > { %1303 = vmatprep.subr.bf16.mxu1 %v3188_v26  ;;  %v3700_v26 = vld [vmem:[%s4093_s18 + $0x40] sm:$0xff]  }
 0x47c   : > { %1304 = vmatpush1.bf16.msra.mxu1 %v3187_v25  ;;  %v3199_v25 = vcombine.low %v1024_v18, %v1032_v19 }
 0x47d   : > { %1383 = vmatprep.subr.bf16.mxu1 %v3176_v35  ;;  %v3709_v35 = vld [vmem:[%s4093_s18 + $0xd0] sm:$0xff]  }
 0x54a   : > { %v969_v60 = vpop.f32.mrb[16].mxu1 }
 0x54b   : > { %v970_v61 = vadd.f32 %v969_v60, %v919_v59  ;;  %v3606_v62 = vpop.f32.mrb[17].mxu1  ;;  %v3178_v59 = vcombine.high %v1005_v53, %v1013_v54  ;;  %v3180_v60 = vcombine.high %v1006_v55, %v1014_v56 }
 0x54c   : > { %v972_v63 = vpop.f32.mrb[18].mxu1  ;;  %v1029_v62 = vld [vmem:[%s4088_s16 + $0xe0] sm:$0xff] }
 0x54d   : > { %v3607_v0 = vpop.f32.mrb[19].mxu1  ;;  %v975_v1 = vadd.f32 %v970_v61, %v4109_v4  ;;  %v3169_v4 = vcombine.low %v1001_v12, %v1009_v13  ;;  %v1021_v61 = vld [vmem:[%s4088_s16 + $0xa0] sm:$0xff]  ;;  %v1022_v63 = vld [vmem:[%s4088_s16 + $0xa8] sm:$0xff]  ;;  %v1016_v12 = vld [vmem:[%s4088_s16 + $0x78] sm:$0xff] }
 0x54e   : > { %v1030_v0 = vld [vmem:[%s4088_s16 + $0xe8] sm:$0xff]  ;;  %v3193_v13 = vcombine.low %v1021_v61, %v1029_v62 }
 0x54f   : > { %v976_v3 = vsel %vm405_vm2, %v975_v1, 0.0  ;;  %1261 = vmatpush1.bf16.msra.mxu0 %v3169_v4  ;;  %v3195_v14 = vcombine.low %v1022_v63, %v1030_v0  ;;  %v1023_v4 = vld [vmem:[%s4088_s16 + $0xb0] sm:$0xff] }
 0x550   : > { %977 = vadd.xlane.f32.xlu0 %v976_v3  ;;  %1262 = vmatprep.subr.bf16.mxu0 %v3186_v22  ;;  %v3179_v3 = vcombine.low %v1006_v55, %v1014_v56  ;;  %v3198_v22 = vcombine.high %v1023_v4, %v1031_v17  ;;  %v3729_v55 = vld [vmem:[%s4093_s18 + $0xf8] sm:$0xff]  }
 0x551   : > { %v3730_v56 = vld [vmem:[%s4093_s18 + $0x38] sm:$0xff]  }
 0x553   : > { %1263 = vmatpush1.bf16.msra.mxu0 %v3185_v24  ;;  %v3197_v24 = vcombine.low %v1023_v4, %v1031_v17 }
 0x554   : > { %1342 = vmatprep.subr.bf16.mxu0 %v3174_v30  ;;  %v3704_v30 = vld [vmem:[%s4093_s18 + $0x48] sm:$0xff]  }
 0x5dd   : > { %v978_v5 = vpop.xlane.xlu0 %977 }
 0x5de   : > { %v980_v6 = vmul.f32 0.03125, %v978_v5  ;;  %v3194_v5 = vcombine.high %v1021_v61, %v1029_v62  ;;  %v369_v61 = vld [vmem:[%s4098_s0 + $0x10] sm:$0xff]  ;;  %v368_v62 = vld [vmem:[%s4098_s0 + $0x8] sm:$0xff] }
 0x5e0   : > { %v981_v8 = vsub.f32 %v975_v1, %v980_v6  ;;  %v3177_v1 = vcombine.low %v1005_v53, %v1013_v54  ;;  %v3196_v6 = vcombine.high %v1022_v63, %v1030_v0  ;;  %v3727_v53 = vld [vmem:[%s4093_s18 + $0xb0] sm:$0xff]   ;;  %v3728_v54 = vld [vmem:[%s4093_s18 + $0x78] sm:$0xff]  }
 0x5e1   : > { %v370_v63 = vld [vmem:[%s4098_s0 + $0x18] sm:$0xff] }
 0x5e2   : > { %v982_v10 = vmul.f32 %v981_v8, %v981_v8 }
 0x5e4   : > { %v983_v11 = vsel %vm405_vm2, %v982_v10, 0.0  ;;  %v1015_v10 = vld [vmem:[%s4088_s16 + $0x70] sm:$0xff] }
 0x5e5   : > { %984 = vadd.xlane.f32.xlu1 %v983_v11  ;;  %v1008_v11 = vld [vmem:[%s4088_s16 + $0x38] sm:$0xff] }
 0x5e6   : > { %v3184_v16 = vcombine.high %v1008_v11, %v1016_v12  ;;  %v3183_v21 = vcombine.low %v1008_v11, %v1016_v12 }
 0x672   : > { %v985_v36 = vpop.xlane.xlu1 %984 }
 0x673   : > { %v986_v37 = vmul.f32 0.03125, %v985_v36  ;;  %v3710_v36 = vld [vmem:[%s4093_s18 + $0x10] sm:$0xff]  }
 0x675   : > { %v987_v38 = vadd.f32 1e-05, %v986_v37  ;;  %v3711_v37 = vld [vmem:[%s4093_s18 + $0x90] sm:$0xff]  }
 0x677   : > { %3844 = vrsqrt.f32 %v987_v38  ;;  %v3712_v38 = vld [vmem:[%s4093_s18 + $0x58] sm:$0xff]  }
 0x681   : > { %v3845_v42 = vpop.eup %3844 }
 0x682   : > { %v989_v44 = vmul.f32 %v3845_v42, %v981_v8  ;;  %v1007_v8 = vld [vmem:[%s4088_s16 + $0x30] sm:$0xff]  ;;  %v3716_v42 = vld [vmem:[%s4093_s18 + $0x60] sm:$0xff]  }
 0x683   : > { %v3182_v15 = vcombine.high %v1007_v8, %v1015_v10  ;;  %v3181_v20 = vcombine.low %v1007_v8, %v1015_v10 }
 0x684   : > { %v994_v45 = vmul.f32 %v993_v41, %v989_v44  ;;  %v3715_v41 = vld [vmem:[%s4093_s18 + $0x98] sm:$0xff]   ;;  %v3718_v44 = vld [vmem:[%s4093_s18 + $0x20] sm:$0xff]  }
 0x686   : > { %v4214_v49 = vadd.f32 %v998_v43, %v994_v45  ;;  %v3717_v43 = vld [vmem:[%s4093_s18 + $0xe0] sm:$0xff]  }
 0x687   : > { %v3719_v45 = vld [vmem:[%s4093_s18 + $0xa0] sm:$0xff]  }
 0x688   : > { %v4218_v50 = vpack.c.bf16 %v4214_v49, %v4214_v49 }
 0x68a   : > { %3201 = vmatmul.mubr.msk.bf16.vlgmr.msra.gmra.mrb[20].mxu0 %vm405_vm2, %v4218_v50  ;;  %3202 = vmatmul.mubr.msk.bf16.vlgmr.msra.gmra.mrb[20].mxu1 %vm405_vm2, %v4218_v50 }
 0x68b   : > { %1343 = vmatpush1.bf16.msra.mxu0 %v3173_v33  ;;  %1384 = vmatpush1.bf16.msra.mxu1 %v3175_v34  ;;  %v3707_v33 = vld [vmem:[%s4093_s18 + $0x88] sm:$0xff]   ;;  %v3708_v34 = vld [vmem:[%s4093_s18 + $0x50] sm:$0xff]  }
 0x68c   : > { %1344 = vmatprep.subr.bf16.mxu0 %v3190_v51  ;;  %1385 = vmatprep.subr.bf16.mxu1 %v3192_v52  ;;  %v3725_v51 = vld [vmem:[%s4093_s18 + $0xf0] sm:$0xff]  }
 0x68d   : > { %1374 = vmatprep.mubr.bf16.mxu0 %v3961_v32  ;;  %1415 = vmatprep.mubr.bf16.mxu1 %v3961_v32  ;;  %v3726_v52 = vld [vmem:[%s4093_s18 + $0x30] sm:$0xff]  }
 0x68f   : > { %1345 = vmatpush1.bf16.msra.mxu0 %v3189_v57  ;;  %1386 = vmatpush1.bf16.msra.mxu1 %v3191_v58  ;;  %v3731_v57 = vld [vmem:[%s4093_s18 + $0xb8] sm:$0xff]   ;;  %v3732_v58 = vld [vmem:[%s4093_s18 + $0x140] sm:$0xff]  }
 0x690   : > { %1424 = vmatprep.subr.bf16.mxu0 %v3178_v59  ;;  %1465 = vmatprep.subr.bf16.mxu1 %v3180_v60  ;;  %v3733_v59 = vld [vmem:[%s4093_s18 + $0x1c0] sm:$0xff]   ;;  %v4293_v60 = vsub.s32 4, %v4120_v7 }
 0x692   : > { %3203 = vmatmul.mubr.msk.bf16.vlgmr.msra.gmra.mrb[24].mxu0 %vm405_vm2, %v4218_v50  ;;  %3204 = vmatmul.mubr.msk.bf16.vlgmr.msra.gmra.mrb[24].mxu1 %vm405_vm2, %v4218_v50  ;;  %v1036_v0 = vrot.slane %v4124_v9, %v4293_v60 }
 0x693   : > { %1425 = vmatpush1.bf16.msra.mxu0 %v3177_v1  ;;  %1466 = vmatpush1.bf16.msra.mxu1 %v3179_v3  ;;  %v1044_v1 = vrot.slane %v369_v61, %v4293_v60  ;;  %v1040_v3 = vrot.slane %v368_v62, %v4293_v60 }
 0x694   : > { %1426 = vmatprep.subr.bf16.mxu0 %v3194_v5  ;;  %1467 = vmatprep.subr.bf16.mxu1 %v3196_v6  ;;  %v1048_v5 = vrot.slane %v370_v63, %v4293_v60  ;;  %v3746_v63 = vld [vmem:[%s4093_s18 + $0x118] sm:$0xff]  }
 0x695   : > { %1456 = vmatprep.mubr.bf16.mxu0 %v3961_v32  ;;  %1497 = vmatprep.mubr.bf16.mxu1 %v3961_v32 }
 0x697   : > { %1427 = vmatpush1.bf16.msra.mxu0 %v3193_v13  ;;  %1468 = vmatpush1.bf16.msra.mxu1 %v3195_v14 }
 0x698   : > { %1506 = vmatprep.subr.bf16.mxu0 %v3182_v15  ;;  %1547 = vmatprep.subr.bf16.mxu1 %v3184_v16 }
 0x69a   : > { %3205 = vmatmul.mubr.msk.bf16.vlgmr.msra.gmra.mrb[28].mxu0 %vm405_vm2, %v4218_v50  ;;  %3206 = vmatmul.mubr.msk.bf16.vlgmr.msra.gmra.mrb[28].mxu1 %vm405_vm2, %v4218_v50 }
 0x69b   : > { %1507 = vmatpush1.bf16.msra.mxu0 %v3181_v20  ;;  %1548 = vmatpush1.bf16.msra.mxu1 %v3183_v21  ;;  %v372_v20 = vld [vmem:[%s4098_s0 + $0x28] sm:$0xff]  ;;  %v374_v21 = vld [vmem:[%s4098_s0 + $0x38] sm:$0xff] }
 0x69c   : > { %1508 = vmatprep.subr.bf16.mxu0 %v3198_v22  ;;  %1549 = vmatprep.subr.bf16.mxu1 %v3200_v23 }
 0x69d   : > { %1538 = vmatprep.mubr.bf16.mxu0 %v3961_v32  ;;  %1579 = vmatprep.mubr.bf16.mxu1 %v3961_v32  ;;  %v3706_v32 = vld [vmem:[%s4093_s18 + $0x8] sm:$0xff]  }
 0x69f   : > { %1509 = vmatpush1.bf16.msra.mxu0 %v3197_v24  ;;  %1550 = vmatpush1.bf16.msra.mxu1 %v3199_v25 }
 0x6a0   : > { %3368 = vmatprep.subr.bf16.mxu0 %v3700_v26  ;;  %3390 = vmatprep.subr.bf16.mxu1 %v3701_v27  ;;  %v1056_v26 = vrot.slane %v372_v20, %v4293_v60  ;;  %v1064_v27 = vrot.slane %v374_v21, %v4293_v60  ;;  %v3754_v21 = vld [vmem:[%s4093_s18 + $0x128] sm:$0xff]  }
 0x6a2   : > { %3207 = vmatmul.mubr.msk.bf16.vlgmr.msra.gmra.mrb[32].mxu0 %vm405_vm2, %v4218_v50  ;;  %3208 = vmatmul.mubr.msk.bf16.vlgmr.msra.gmra.mrb[32].mxu1 %vm405_vm2, %v4218_v50  ;;  %v3724_v50 = vld [vmem:[%s4093_s18 + $0x70] sm:$0xff]  }
 0x6a3   : > { %3369 = vmatpush3.bf16.msra.mxu0 %v3702_v28  ;;  %3391 = vmatpush3.bf16.msra.mxu1 %v3703_v29  ;;  %v3734_v28 = vld [vmem:[%s4093_s18 + $0x100] sm:$0xff]  }
 0x6a4   : > { %3370 = vmatprep.subr.bf16.mxu0 %v3704_v30  ;;  %3392 = vmatprep.subr.bf16.mxu1 %v3705_v31  ;;  %v3735_v29 = vld [vmem:[%s4093_s18 + $0x180] sm:$0xff]  }
 0x6a7   : > { %3371 = vmatpush3.bf16.msra.mxu0 %v3706_v32  ;;  %3393 = vmatpush3.bf16.msra.mxu1 %v3707_v33  ;;  %v3736_v32 = vld [vmem:[%s4093_s18 + $0x148] sm:$0xff]  }
 0x6a8   : > { %3372 = vmatprep.subr.bf16.mxu0 %v3708_v34  ;;  %3394 = vmatprep.subr.bf16.mxu1 %v3709_v35  ;;  %v3737_v33 = vld [vmem:[%s4093_s18 + $0x1c8] sm:$0xff]  }
 0x6ab   : > { %3373 = vmatpush3.bf16.msra.mxu0 %v3710_v36  ;;  %3395 = vmatpush3.bf16.msra.mxu1 %v3711_v37 }
 0x6ac   : > { %3374 = vmatprep.subr.bf16.mxu0 %v3712_v38  ;;  %3396 = vmatprep.subr.bf16.mxu1 %v3713_v39 }
 0x6af   : > { %3375 = vmatpush3.bf16.msra.mxu0 %v3714_v40  ;;  %3397 = vmatpush3.bf16.msra.mxu1 %v3715_v41 }
 0x6b0   : > { %3376 = vmatprep.subr.bf16.mxu0 %v3716_v42  ;;  %3398 = vmatprep.subr.bf16.mxu1 %v3717_v43  ;;  %v3738_v42 = vld [vmem:[%s4093_s18 + $0x108] sm:$0xff]  }
 0x6b1   : > { %v3739_v43 = vld [vmem:[%s4093_s18 + $0x188] sm:$0xff]  }
 0x6b3   : > { %3377 = vmatpush3.bf16.msra.mxu0 %v3718_v44  ;;  %3399 = vmatpush3.bf16.msra.mxu1 %v3719_v45 }
 0x6b4   : > { %3378 = vmatprep.subr.bf16.mxu0 %v3720_v46  ;;  %3400 = vmatprep.subr.bf16.mxu1 %v3721_v47  ;;  %v3740_v46 = vld [vmem:[%s4093_s18 + $0x150] sm:$0xff]  }
 0x6b5   : > { %v3741_v47 = vld [vmem:[%s4093_s18 + $0x1d0] sm:$0xff]  }
 0x6b7   : > { %3379 = vmatpush3.bf16.msra.mxu0 %v3722_v2  ;;  %3401 = vmatpush3.bf16.msra.mxu1 %v3723_v48 }
 0x6b8   : > { %3380 = vmatprep.subr.bf16.mxu0 %v3724_v50  ;;  %3402 = vmatprep.subr.bf16.mxu1 %v3725_v51 }
 0x6bb   : > { %3381 = vmatpush3.bf16.msra.mxu0 %v3726_v52  ;;  %3403 = vmatpush3.bf16.msra.mxu1 %v3727_v53  ;;  %v3742_v52 = vld [vmem:[%s4093_s18 + $0x110] sm:$0xff]  }
 0x6bc   : > { %3382 = vmatprep.subr.bf16.mxu0 %v3728_v54  ;;  %3404 = vmatprep.subr.bf16.mxu1 %v3729_v55  ;;  %v3743_v53 = vld [vmem:[%s4093_s18 + $0x190] sm:$0xff]   ;;  %v3744_v54 = vld [vmem:[%s4093_s18 + $0x158] sm:$0xff]  }
 0x6bd   : > { %v3745_v55 = vld [vmem:[%s4093_s18 + $0x1d8] sm:$0xff]  }
 0x6bf   : > { %3383 = vmatpush3.bf16.msra.mxu0 %v3730_v56  ;;  %3405 = vmatpush3.bf16.msra.mxu1 %v3731_v57 }
 0x6c0   : > { %3412 = vmatprep.subr.bf16.mxu0 %v3732_v58  ;;  %3434 = vmatprep.subr.bf16.mxu1 %v3733_v59 }
 0x75d   : > { %v1294_v6 = vpop.f32.mrb[20].mxu0  ;;  %v1335_v8 = vpop.f32.mrb[20].mxu1 }
 0x75e   : > { %v1295_v10 = vadd.f32 %v1294_v6, %v1036_v0  ;;  %v1336_v11 = vadd.f32 %v1335_v8, %v1044_v1  ;;  %v1296_v12 = vpop.f32.mrb[21].mxu0  ;;  %v1337_v13 = vpop.f32.mrb[21].mxu1  ;;  %v3747_v0 = vld [vmem:[%s4093_s18 + $0x198] sm:$0xff]   ;;  %v3749_v6 = vld [vmem:[%s4093_s18 + $0x1e0] sm:$0xff]  }
 0x75f   : > { %v1297_v14 = vadd.f32 %v1296_v12, %v1040_v3  ;;  %v1338_v15 = vadd.f32 %v1337_v13, %v1048_v5  ;;  %v1298_v16 = vpop.f32.mrb[22].mxu0  ;;  %v1339_v9 = vpop.f32.mrb[22].mxu1  ;;  %v3748_v5 = vld [vmem:[%s4093_s18 + $0x160] sm:$0xff]   ;;  %v3753_v12 = vld [vmem:[%s4093_s18 + $0x1e8] sm:$0xff]  }
 0x760   : > { %v1588_v4 = vmax.f32 %v1295_v10, 0.0  ;;  %v1590_v17 = vmax.f32 %v1336_v11, 0.0  ;;  %v1299_v18 = vpop.f32.mrb[23].mxu0  ;;  %v1340_v19 = vpop.f32.mrb[23].mxu1  ;;  %v3750_v8 = vld [vmem:[%s4093_s18 + $0x120] sm:$0xff]   ;;  %v3752_v11 = vld [vmem:[%s4093_s18 + $0x168] sm:$0xff]  }
 0x761   : > { %v1589_v22 = vmax.f32 %v1297_v14, 0.0  ;;  %v1591_v23 = vmax.f32 %v1338_v15, 0.0  ;;  %v3751_v10 = vld [vmem:[%s4093_s18 + $0x1a0] sm:$0xff]   ;;  %v373_v14 = vld [vmem:[%s4098_s0 + $0x30] sm:$0xff]  ;;  %v376_v9 = vld [vmem:[%s4098_s0 + $0x48] sm:$0xff] }
 0x762   : > { %v1604_v30 = vpack.c.bf16 %v1588_v4, %v1588_v4  ;;  %v1606_v31 = vpack.c.bf16 %v1590_v17, %v1590_v17  ;;  %v371_v13 = vld [vmem:[%s4098_s0 + $0x20] sm:$0xff]  ;;  %v378_v18 = vld [vmem:[%s4098_s0 + $0x58] sm:$0xff] }
 0x763   : > { %v1605_v24 = vpack.c.bf16 %v1589_v22, %v1589_v22  ;;  %v1607_v25 = vpack.c.bf16 %v1591_v23, %v1591_v23  ;;  %v3755_v22 = vld [vmem:[%s4093_s18 + $0x1a8] sm:$0xff]   ;;  %v1052_v23 = vrot.slane %v371_v13, %v4293_v60  ;;  %v375_v13 = vld [vmem:[%s4098_s0 + $0x40] sm:$0xff] }
 0x765   : > { %v4311_v34 = vpop.f32.mrb[24].mxu0  ;;  %v4313_v35 = vpop.f32.mrb[24].mxu1  ;;  %2680 = vmatprep.mubr.bf16.mxu0 %v1605_v24  ;;  %2720 = vmatprep.mubr.bf16.mxu1 %v1607_v25  ;;  %v1060_v24 = vrot.slane %v373_v14, %v4293_v60  ;;  %v3785_v14 = vld [vmem:[%s4093_s18 + $0x2e8] sm:$0xff]  }
 0x766   : > { %v1378_v36 = vpop.f32.mrb[25].mxu0  ;;  %v1419_v37 = vpop.f32.mrb[25].mxu1  ;;  %2681 = vmatmul.mubr.bf16.vlgmr.msra.gmra.mrb[36].mxu0 %v1604_v30  ;;  %2721 = vmatmul.mubr.bf16.vlgmr.msra.gmra.mrb[36].mxu1 %v1606_v31  ;;  %v1080_v30 = vrot.slane %v378_v18, %v4293_v60  ;;  %v3758_v31 = vld [vmem:[%s4093_s18 + $0x130] sm:$0xff]   ;;  %v380_v18 = vld [vmem:[%s4098_s0 + $0x68] sm:$0xff] }
 0x767   : > { %v1379_v38 = vadd.f32 %v1378_v36, %v1056_v26  ;;  %v1420_v39 = vadd.f32 %v1419_v37, %v1064_v27  ;;  %3413 = vmatpush3.bf16.msra.mxu0 %v3734_v28  ;;  %3435 = vmatpush3.bf16.msra.mxu1 %v3735_v29  ;;  %v1380_v40 = vpop.f32.mrb[26].mxu0  ;;  %v1421_v41 = vpop.f32.mrb[26].mxu1  ;;  %v3756_v27 = vld [vmem:[%s4093_s18 + $0x170] sm:$0xff]   ;;  %v1072_v29 = vrot.slane %v376_v9, %v4293_v60  ;;  %v3760_v37 = vld [vmem:[%s4093_s18 + $0x178] sm:$0xff]  }
 0x768   : > { %v1381_v44 = vpop.f32.mrb[27].mxu0  ;;  %v1422_v45 = vpop.f32.mrb[27].mxu1  ;;  %3414 = vmatprep.subr.bf16.mxu0 %v3736_v32  ;;  %3436 = vmatprep.subr.bf16.mxu1 %v3737_v33  ;;  %v3757_v28 = vld [vmem:[%s4093_s18 + $0x1f0] sm:$0xff]   ;;  %v1377_v33 = vadd.f32 %v4311_v34, %v1052_v23  ;;  %v1418_v36 = vadd.f32 %v4313_v35, %v1060_v24  ;;  %v3762_v41 = vld [vmem:[%s4093_s18 + $0x138] sm:$0xff]   ;;  %v3764_v34 = vld [vmem:[%s4093_s18 + $0x240] sm:$0xff]  }
 0x769   : > { %v1593_v2 = vmax.f32 %v1379_v38, 0.0  ;;  %v1595_v48 = vmax.f32 %v1420_v39, 0.0  ;;  %v3759_v32 = vld [vmem:[%s4093_s18 + $0x1b0] sm:$0xff]   ;;  %v3761_v38 = vld [vmem:[%s4093_s18 + $0x1f8] sm:$0xff]   ;;  %v3765_v35 = vld [vmem:[%s4093_s18 + $0x2c0] sm:$0xff]  }
 0x76a   : > { %v1594_v44 = vmax.f32 %v1418_v36, 0.0  ;;  %v377_v9 = vld [vmem:[%s4098_s0 + $0x50] sm:$0xff] }
 0x76b   : > { %v1609_v50 = vpack.c.bf16 %v1593_v2, %v1593_v2  ;;  %v1611_v51 = vpack.c.bf16 %v1595_v48, %v1595_v48  ;;  %3415 = vmatpush3.bf16.msra.mxu0 %v3738_v42  ;;  %3437 = vmatpush3.bf16.msra.mxu1 %v3739_v43  ;;  %v3763_v42 = vld [vmem:[%s4093_s18 + $0x1b8] sm:$0xff]   ;;  %v1592_v43 = vmax.f32 %v1377_v33, 0.0  ;;  %v3788_v23 = vld [vmem:[%s4093_s18 + $0x270] sm:$0xff]   ;;  %v1076_v24 = vrot.slane %v377_v9, %v4293_v60 }
 0x76c   : > { %3416 = vmatprep.subr.bf16.mxu0 %v3740_v46  ;;  %3438 = vmatprep.subr.bf16.mxu1 %v3741_v47  ;;  %v3766_v47 = vld [vmem:[%s4093_s18 + $0x200] sm:$0xff]   ;;  %v1610_v48 = vpack.c.bf16 %v1594_v44, %v1594_v44  ;;  %v3793_v33 = vld [vmem:[%s4093_s18 + $0x2f8] sm:$0xff]   ;;  %v3822_v9 = vld [vmem:[%s4093_s18 + $0x330] sm:$0xff]  }
 0x76d   : > { %v4323_v56 = vpop.f32.mrb[28].mxu0  ;;  %v4325_v57 = vpop.f32.mrb[28].mxu1  ;;  %2760 = vmatprep.mubr.bf16.mxu0 %v1609_v50  ;;  %2800 = vmatprep.mubr.bf16.mxu1 %v1611_v51  ;;  %v1608_v2 = vpack.c.bf16 %v1592_v43, %v1592_v43  ;;  %v3767_v50 = vld [vmem:[%s4093_s18 + $0x280] sm:$0xff]  }
 0x76e   : > { %v1460_v58 = vpop.f32.mrb[29].mxu0  ;;  %v1501_v59 = vpop.f32.mrb[29].mxu1 }
 0x76f   : > { %3417 = vmatpush3.bf16.msra.mxu0 %v3742_v52  ;;  %3439 = vmatpush3.bf16.msra.mxu1 %v3743_v53  ;;  %v1462_v61 = vpop.f32.mrb[30].mxu0  ;;  %v1503_v62 = vpop.f32.mrb[30].mxu1  ;;  %v1461_v39 = vadd.f32 %v1460_v58, %v1072_v29  ;;  %v1502_v40 = vadd.f32 %v1501_v59, %v1080_v30  ;;  %v3768_v52 = vld [vmem:[%s4093_s18 + $0x248] sm:$0xff]   ;;  %v3772_v59 = vld [vmem:[%s4093_s18 + $0x250] sm:$0xff]  }
 0x770   : > { %v1463_v1 = vpop.f32.mrb[31].mxu0  ;;  %v1504_v3 = vpop.f32.mrb[31].mxu1  ;;  %3418 = vmatprep.subr.bf16.mxu0 %v3744_v54  ;;  %3440 = vmatprep.subr.bf16.mxu1 %v3745_v55  ;;  %v3769_v53 = vld [vmem:[%s4093_s18 + $0x2c8] sm:$0xff]   ;;  %v3773_v61 = vld [vmem:[%s4093_s18 + $0x2d0] sm:$0xff]  }
 0x771   : > { %v1597_v45 = vmax.f32 %v1461_v39, 0.0  ;;  %v1599_v46 = vmax.f32 %v1502_v40, 0.0  ;;  %v3770_v55 = vld [vmem:[%s4093_s18 + $0x208] sm:$0xff]   ;;  %v3774_v62 = vld [vmem:[%s4093_s18 + $0x210] sm:$0xff]   ;;  %v3777_v1 = vld [vmem:[%s4093_s18 + $0x2d8] sm:$0xff]  }
 0x772   : > { %v3771_v58 = vld [vmem:[%s4093_s18 + $0x288] sm:$0xff]   ;;  %v3778_v3 = vld [vmem:[%s4093_s18 + $0x218] sm:$0xff]   ;;  %v3791_v30 = vld [vmem:[%s4093_s18 + $0x2b0] sm:$0xff]  }
 0x773   : > { %3419 = vmatpush3.bf16.msra.mxu0 %v3746_v63  ;;  %3441 = vmatpush3.bf16.msra.mxu1 %v3747_v0  ;;  %v1613_v51 = vpack.c.bf16 %v1597_v45, %v1597_v45  ;;  %v1615_v54 = vpack.c.bf16 %v1599_v46, %v1599_v46  ;;  %v3775_v63 = vld [vmem:[%s4093_s18 + $0x290] sm:$0xff]   ;;  %v3776_v0 = vld [vmem:[%s4093_s18 + $0x258] sm:$0xff]   ;;  %v3796_v40 = vld [vmem:[%s4093_s18 + $0x340] sm:$0xff]  }
 0x774   : > { %3420 = vmatprep.subr.bf16.mxu0 %v3748_v5  ;;  %3442 = vmatprep.subr.bf16.mxu1 %v3749_v6  ;;  %v3779_v5 = vld [vmem:[%s4093_s18 + $0x298] sm:$0xff]   ;;  %v3780_v6 = vld [vmem:[%s4093_s18 + $0x260] sm:$0xff]   ;;  %v3801_v46 = vld [vmem:[%s4093_s18 + $0x3c8] sm:$0xff]  }
 0x775   : > { %v4337_v15 = vpop.f32.mrb[32].mxu0  ;;  %v4339_v16 = vpop.f32.mrb[32].mxu1 }
 0x776   : > { %v4342_v4 = vpop.f32.mrb[33].mxu0  ;;  %v4344_v17 = vpop.f32.mrb[33].mxu1 }
 0x777   : > { %3421 = vmatpush3.bf16.msra.mxu0 %v3750_v8  ;;  %3443 = vmatpush3.bf16.msra.mxu1 %v3751_v10  ;;  %v1544_v19 = vpop.f32.mrb[34].mxu0  ;;  %v1585_v20 = vpop.f32.mrb[34].mxu1  ;;  %v3781_v8 = vld [vmem:[%s4093_s18 + $0x2e0] sm:$0xff]  }
 0x778   : > { %v1545_v25 = vpop.f32.mrb[35].mxu0  ;;  %v1586_v26 = vpop.f32.mrb[35].mxu1  ;;  %3422 = vmatprep.subr.bf16.mxu0 %v3752_v11  ;;  %3444 = vmatprep.subr.bf16.mxu1 %v3753_v12  ;;  %v3782_v10 = vld [vmem:[%s4093_s18 + $0x220] sm:$0xff]   ;;  %v3784_v12 = vld [vmem:[%s4093_s18 + $0x268] sm:$0xff]   ;;  %v1068_v20 = vrot.slane %v375_v13, %v4293_v60 }
 0x779   : > { %v3783_v11 = vld [vmem:[%s4093_s18 + $0x2a0] sm:$0xff]   ;;  %v3786_v19 = vld [vmem:[%s4093_s18 + $0x228] sm:$0xff]   ;;  %v3789_v25 = vld [vmem:[%s4093_s18 + $0x2f0] sm:$0xff]   ;;  %v1088_v26 = vrot.slane %v380_v18, %v4293_v60 }
 0x77a   : > { %v1459_v29 = vadd.f32 %v4323_v56, %v1068_v20  ;;  %v3795_v56 = vld [vmem:[%s4093_s18 + $0x2b8] sm:$0xff]  }
 0x77b   : > { %3423 = vmatpush3.bf16.msra.mxu0 %v3754_v21  ;;  %3445 = vmatpush3.bf16.msra.mxu1 %v3755_v22  ;;  %v382_v21 = vld [vmem:[%s4098_s0 + $0x78] sm:$0xff]  ;;  %v3787_v22 = vld [vmem:[%s4093_s18 + $0x2a8] sm:$0xff]   ;;  %v1543_v36 = vadd.f32 %v4342_v4, %v1088_v26  ;;  %v3798_v4 = vld [vmem:[%s4093_s18 + $0x300] sm:$0xff]  }
 0x77c   : > { %3424 = vmatprep.subr.bf16.mxu0 %v3756_v27  ;;  %3446 = vmatprep.subr.bf16.mxu1 %v3757_v28  ;;  %v1096_v27 = vrot.slane %v382_v21, %v4293_v60  ;;  %v3790_v28 = vld [vmem:[%s4093_s18 + $0x230] sm:$0xff]   ;;  %v1596_v39 = vmax.f32 %v1459_v29, 0.0  ;;  %v3824_v20 = vld [vmem:[%s4093_s18 + $0x378] sm:$0xff]   ;;  %v4447_v29 = vld [vmem:[%s4098_s0] sm:$0xff] }
 0x77e   : > { %v1612_v44 = vpack.c.bf16 %v1596_v39, %v1596_v39 }
 0x77f   : > { %3425 = vmatpush3.bf16.msra.mxu0 %v3758_v31  ;;  %3447 = vmatpush3.bf16.msra.mxu1 %v3759_v32  ;;  %v3792_v31 = vld [vmem:[%s4093_s18 + $0x278] sm:$0xff]   ;;  %v1500_v32 = vadd.f32 %v4325_v57, %v1076_v24  ;;  %v3797_v57 = vld [vmem:[%s4093_s18 + $0x3c0] sm:$0xff]  }
 0x780   : > { %3426 = vmatprep.subr.bf16.mxu0 %v3760_v37  ;;  %3448 = vmatprep.subr.bf16.mxu1 %v3761_v38  ;;  %v1584_v37 = vadd.f32 %v4344_v17, %v1096_v27  ;;  %v3794_v38 = vld [vmem:[%s4093_s18 + $0x238] sm:$0xff]   ;;  %v3799_v17 = vld [vmem:[%s4093_s18 + $0x380] sm:$0xff]   ;;  %v1878_v27 = vsub.s32 5, %v4120_v7 }
 0x782   : > { %v1603_v43 = vmax.f32 %v1584_v37, 0.0 }
 0x783   : > { %3427 = vmatpush3.bf16.msra.mxu0 %v3762_v41  ;;  %3449 = vmatpush3.bf16.msra.mxu1 %v3763_v42  ;;  %v1598_v41 = vmax.f32 %v1500_v32, 0.0  ;;  %v1601_v42 = vmax.f32 %v1543_v36, 0.0 }
 0x784   : > { %3456 = vmatprep.subr.bf16.mxu0 %v3764_v34  ;;  %3478 = vmatprep.subr.bf16.mxu1 %v3765_v35  ;;  %v3800_v35 = vld [vmem:[%s4093_s18 + $0x348] sm:$0xff]  }
 0x785   : > { %v1614_v34 = vpack.c.bf16 %v1598_v41, %v1598_v41  ;;  %v1617_v45 = vpack.c.bf16 %v1601_v42, %v1601_v42 }
 0x786   : > { %2761 = vmatmul.mubr.bf16.vlgmr.msra.gmra.mrb[40].mxu0 %v1608_v2  ;;  %2801 = vmatmul.mubr.bf16.vlgmr.msra.gmra.mrb[40].mxu1 %v1610_v48  ;;  %v3802_v2 = vld [vmem:[%s4093_s18 + $0x308] sm:$0xff]  }
 0x787   : > { %3457 = vmatpush3.bf16.msra.mxu0 %v3766_v47  ;;  %2840 = vmatprep.mubr.bf16.mxu0 %v1613_v51  ;;  %v1619_v47 = vpack.c.bf16 %v1603_v43, %v1603_v43  ;;  %v3803_v48 = vld [vmem:[%s4093_s18 + $0x388] sm:$0xff]   ;;  %v3805_v51 = vld [vmem:[%s4093_s18 + $0x3d0] sm:$0xff]  }
 0x788   : > { %3479 = vmatpush3.bf16.msra.mxu1 %v3767_v50  ;;  %2880 = vmatprep.mubr.bf16.mxu1 %v1615_v54  ;;  %v3804_v50 = vld [vmem:[%s4093_s18 + $0x350] sm:$0xff]   ;;  %v3808_v54 = vld [vmem:[%s4093_s18 + $0x358] sm:$0xff]  }
 0x789   : > { %3458 = vmatprep.subr.bf16.mxu0 %v3768_v52  ;;  %3480 = vmatprep.subr.bf16.mxu1 %v3769_v53  ;;  %v3806_v52 = vld [vmem:[%s4093_s18 + $0x310] sm:$0xff]  }
 0x78a   : > { %v3807_v53 = vld [vmem:[%s4093_s18 + $0x390] sm:$0xff]  }
 0x78b   : > { %3459 = vmatpush3.bf16.msra.mxu0 %v3770_v55  ;;  %v3809_v55 = vld [vmem:[%s4093_s18 + $0x3d8] sm:$0xff]  }
 0x78c   : > { %3481 = vmatpush3.bf16.msra.mxu1 %v3771_v58  ;;  %3460 = vmatprep.subr.bf16.mxu0 %v3772_v59  ;;  %v3810_v58 = vld [vmem:[%s4093_s18 + $0x318] sm:$0xff]  }
 0x78d   : > { %3482 = vmatprep.subr.bf16.mxu1 %v3773_v61  ;;  %v3811_v59 = vld [vmem:[%s4093_s18 + $0x398] sm:$0xff]   ;;  %v3812_v61 = vld [vmem:[%s4093_s18 + $0x360] sm:$0xff]  }
 0x78f   : > { %3461 = vmatpush3.bf16.msra.mxu0 %v3774_v62  ;;  %v3813_v62 = vld [vmem:[%s4093_s18 + $0x3e0] sm:$0xff]  }
 0x790   : > { %3483 = vmatpush3.bf16.msra.mxu1 %v3775_v63  ;;  %3462 = vmatprep.subr.bf16.mxu0 %v3776_v0  ;;  %v3814_v63 = vld [vmem:[%s4093_s18 + $0x320] sm:$0xff]  }
 0x791   : > { %3484 = vmatprep.subr.bf16.mxu1 %v3777_v1  ;;  %v3815_v0 = vld [vmem:[%s4093_s18 + $0x3a0] sm:$0xff]   ;;  %v3816_v1 = vld [vmem:[%s4093_s18 + $0x368] sm:$0xff]  }
 0x793   : > { %3463 = vmatpush3.bf16.msra.mxu0 %v3778_v3  ;;  %v379_v3 = vld [vmem:[%s4098_s0 + $0x60] sm:$0xff] }
 0x794   : > { %3485 = vmatpush3.bf16.msra.mxu1 %v3779_v5  ;;  %3464 = vmatprep.subr.bf16.mxu0 %v3780_v6  ;;  %v3817_v5 = vld [vmem:[%s4093_s18 + $0x3e8] sm:$0xff]   ;;  %v381_v6 = vld [vmem:[%s4098_s0 + $0x70] sm:$0xff]  ;;  %s3338_s0 = sshll.u32 %s3931_s25, 7  ;;  %s3962_s25 = smov [#allocation2]  }
 0x795   : > { %3486 = vmatprep.subr.bf16.mxu1 %v3781_v8  ;;  %v3818_v8 = vld [vmem:[%s4093_s18 + $0x328] sm:$0xff]   ;;  %v1092_v13 = vrot.slane %v381_v6, %v4293_v60  ;;  %s4462_s11 = scalar_lea.hbm %s4525_s6, %s3338_s0  ;;  %s3853_s24 = sshll.u32 %s3962_s25, 4  ;;  %s3854_s24 = int_to_ptr.vmem [resolvable:$false] %s3853_s24 }
 0x796   : > { %s3855_s7 = scalar_lea.vmem %s3854_s24, 256  ;;  %p3856_p5 = scmp.lt.s32.totalorder %s4464_s26, %s3854_s24 }
 0x797   : > { %3465 = vmatpush3.bf16.msra.mxu0 %v3782_v10  ;;  %v1084_v10 = vrot.slane %v379_v3, %v4293_v60  ;;  %v1582_v21 = vadd.f32 %v4339_v16, %v1092_v13  ;;  %v3827_v60 = vld [vmem:[%s4093_s18 + $0x3b8] sm:$0xff]   ;;  %p3857_p6 = scmp.lt.s32.totalorder %s3855_s7, %s3849_s23 }
 0x798   : > { %3487 = vmatpush3.bf16.msra.mxu1 %v3783_v11  ;;  %3466 = vmatprep.subr.bf16.mxu0 %v3784_v12  ;;  %v3819_v11 = vld [vmem:[%s4093_s18 + $0x3a8] sm:$0xff]   ;;  %v3820_v12 = vld [vmem:[%s4093_s18 + $0x370] sm:$0xff]  }
 0x799   : > { %3488 = vmatprep.subr.bf16.mxu1 %v3785_v14  ;;  %v3821_v14 = vld [vmem:[%s4093_s18 + $0x3f0] sm:$0xff]   ;;  %v1541_v18 = vadd.f32 %v4337_v15, %v1084_v10  ;;  %p3858_p7 = por %p3857_p6, %p3856_p5 }
 0x79b   : > { %3467 = vmatpush3.bf16.msra.mxu0 %v3786_v19  ;;  %v3823_v19 = vld [vmem:[%s4093_s18 + $0x3b0] sm:$0xff]   ;;  %v1600_v24 = vmax.f32 %v1541_v18, 0.0  ;;  %p3859_p8 = pnand %p3858_p7, %p3852_p4 }
 0x79c   : > { %3489 = vmatpush3.bf16.msra.mxu1 %v3787_v22  ;;  %3468 = vmatprep.subr.bf16.mxu0 %v3788_v23  ;;  %v3825_v22 = vld [vmem:[%s4093_s18 + $0x3f8] sm:$0xff]  }
 0x79d   : > { %3490 = vmatprep.subr.bf16.mxu1 %v3789_v25  ;;  %v3826_v23 = vld [vmem:[%s4093_s18 + $0x338] sm:$0xff]   ;;  %v1602_v25 = vmax.f32 %v1582_v21, 0.0  ;;  %v1616_v26 = vpack.c.bf16 %v1600_v24, %v1600_v24 }
 0x79f   : > { %3469 = vmatpush3.bf16.msra.mxu0 %v3790_v28  ;;  %v1618_v15 = vpack.c.bf16 %v1602_v25, %v1602_v25 }
 0x7a0   : > { %3491 = vmatpush3.bf16.msra.mxu1 %v3791_v30  ;;  %3470 = vmatprep.subr.bf16.mxu0 %v3792_v31  ;;  %v1879_v30 = vrot.slane %v4447_v29, %v1878_v27 }
 0x7a1   : > { %3492 = vmatprep.subr.bf16.mxu1 %v3793_v33 }
 0x7a3   : > { %3471 = vmatpush3.bf16.msra.mxu0 %v3794_v38 }
 0x7a4   : > { %3493 = vmatpush3.bf16.msra.mxu1 %v3795_v56  ;;  %3500 = vmatprep.subr.bf16.mxu0 %v3796_v40 }
 0x7a5   : > { %3522 = vmatprep.subr.bf16.mxu1 %v3797_v57 }
 0x7a6   : > { %2841 = vmatmul.mubr.bf16.vlgmr.msra.gmra.mrb[44].mxu0 %v1612_v44 }
 0x7a7   : > { %2881 = vmatmul.mubr.bf16.vlgmr.msra.gmra.mrb[44].mxu1 %v1614_v34  ;;  %3501 = vmatpush3.bf16.msra.mxu0 %v3798_v4 }
 0x7a8   : > { %2920 = vmatprep.mubr.bf16.mxu0 %v1617_v45  ;;  %3523 = vmatpush3.bf16.msra.mxu1 %v3799_v17 }
 0x7a9   : > { %2960 = vmatprep.mubr.bf16.mxu1 %v1619_v47  ;;  %3502 = vmatprep.subr.bf16.mxu0 %v3800_v35 }
 0x7aa   : > { %3524 = vmatprep.subr.bf16.mxu1 %v3801_v46 }
 0x7ab   : > { %3503 = vmatpush3.bf16.msra.mxu0 %v3802_v2 }
 0x7ac   : > { %3525 = vmatpush3.bf16.msra.mxu1 %v3803_v48  ;;  %3504 = vmatprep.subr.bf16.mxu0 %v3804_v50 }
 0x7ad   : > { %3526 = vmatprep.subr.bf16.mxu1 %v3805_v51 }
 0x7af   : > { %3505 = vmatpush3.bf16.msra.mxu0 %v3806_v52 }
 0x7b0   : > { %3527 = vmatpush3.bf16.msra.mxu1 %v3807_v53  ;;  %3506 = vmatprep.subr.bf16.mxu0 %v3808_v54 }
 0x7b1   : > { %3528 = vmatprep.subr.bf16.mxu1 %v3809_v55 }
 0x7b3   : > { %3507 = vmatpush3.bf16.msra.mxu0 %v3810_v58 }
 0x7b4   : > { %3529 = vmatpush3.bf16.msra.mxu1 %v3811_v59  ;;  %3508 = vmatprep.subr.bf16.mxu0 %v3812_v61 }
 0x7b5   : > { %3530 = vmatprep.subr.bf16.mxu1 %v3813_v62 }
 0x7b7   : > { %3509 = vmatpush3.bf16.msra.mxu0 %v3814_v63 }
 0x7b8   : > { %3531 = vmatpush3.bf16.msra.mxu1 %v3815_v0  ;;  %3510 = vmatprep.subr.bf16.mxu0 %v3816_v1 }
 0x7b9   : > { %3532 = vmatprep.subr.bf16.mxu1 %v3817_v5 }
 0x7bb   : > { %3511 = vmatpush3.bf16.msra.mxu0 %v3818_v8 }
 0x7bc   : > { %3533 = vmatpush3.bf16.msra.mxu1 %v3819_v11  ;;  %3512 = vmatprep.subr.bf16.mxu0 %v3820_v12 }
 0x7bd   : > { %3534 = vmatprep.subr.bf16.mxu1 %v3821_v14 }
 0x7bf   : > { %3513 = vmatpush3.bf16.msra.mxu0 %v3822_v9 }
 0x7c0   : > { %3535 = vmatpush3.bf16.msra.mxu1 %v3823_v19  ;;  %3514 = vmatprep.subr.bf16.mxu0 %v3824_v20 }
 0x7c1   : > { %3536 = vmatprep.subr.bf16.mxu1 %v3825_v22 }
 0x7c3   : > { %3515 = vmatpush3.bf16.msra.mxu0 %v3826_v23 }
 0x7c4   : > { %3537 = vmatpush3.bf16.msra.mxu1 %v3827_v60 }
 0x7c6   : > { %2921 = vmatmul.mubr.bf16.vlgmr.msra.gmra.mrb[48].mxu0 %v1616_v26 }
 0x7c7   : > { %2961 = vmatmul.mubr.bf16.vlgmr.msra.gmra.mrb[48].mxu1 %v1618_v15  ;;  %v2989_v15 = vsub.s32 7, %v4120_v7 }
 0x839   : > { %v3384_v16 = vpop.f32.mrb[36].mxu0  ;;  %v3406_v28 = vpop.f32.mrb[36].mxu1 }
 0x83a   : > { %v3385_v31 = vpop.f32.mrb[37].mxu0  ;;  %v3407_v32 = vpop.f32.mrb[37].mxu1 }
 0x83b   : > { %v3386_v33 = vadd.f32 %v3385_v31, %v3384_v16  ;;  %v3408_v36 = vadd.f32 %v3407_v32, %v3406_v28  ;;  %v3387_v37 = vpop.f32.mrb[38].mxu0  ;;  %v3409_v38 = vpop.f32.mrb[38].mxu1 }
 0x83c   : > { %v3388_v39 = vpop.f32.mrb[39].mxu0  ;;  %v3410_v56 = vpop.f32.mrb[39].mxu1 }
 0x83d   : > { %v2683_v40 = vadd.f32 %v3386_v33, %v1879_v30  ;;  %v2990_v30 = vrot.slane %v4447_v29, %v2989_v15 }
 0x83f   : > { %v2723_v41 = vadd.f32 %v3408_v36, %v2683_v40 }
 0x859   : > { %v3428_v57 = vpop.f32.mrb[40].mxu0  ;;  %v3450_v42 = vpop.f32.mrb[40].mxu1 }
 0x85a   : > { %v3429_v43 = vpop.f32.mrb[41].mxu0  ;;  %v3451_v4 = vpop.f32.mrb[41].mxu1 }
 0x85b   : > { %v3430_v44 = vadd.f32 %v3429_v43, %v3428_v57  ;;  %v3452_v17 = vadd.f32 %v3451_v4, %v3450_v42  ;;  %v3431_v34 = vpop.f32.mrb[42].mxu0  ;;  %v3453_v35 = vpop.f32.mrb[42].mxu1 }
 0x85c   : > { %v3432_v45 = vpop.f32.mrb[43].mxu0  ;;  %v3454_v46 = vpop.f32.mrb[43].mxu1 }
 0x85d   : > { %v2763_v47 = vadd.f32 %v3430_v44, %v2723_v41 }
 0x85f   : > { %v2803_v2 = vadd.f32 %v3452_v17, %v2763_v47 }
 0x879   : > { %v3472_v48 = vpop.f32.mrb[44].mxu0 }
 0x87a   : > { %v3494_v50 = vpop.f32.mrb[44].mxu1  ;;  %v3473_v51 = vpop.f32.mrb[45].mxu0 }
 0x87b   : > { %v3474_v52 = vadd.f32 %v3473_v51, %v3472_v48  ;;  %v3495_v53 = vpop.f32.mrb[45].mxu1  ;;  %v3475_v54 = vpop.f32.mrb[46].mxu0 }
 0x87c   : > { %v3496_v55 = vadd.f32 %v3495_v53, %v3494_v50  ;;  %v3497_v58 = vpop.f32.mrb[46].mxu1  ;;  %v3476_v59 = vpop.f32.mrb[47].mxu0 }
 0x87d   : > { %v2843_v61 = vadd.f32 %v3474_v52, %v2803_v2  ;;  %v3498_v62 = vpop.f32.mrb[47].mxu1 }
 0x87f   : > { %v2883_v63 = vadd.f32 %v3496_v55, %v2843_v61 }
 0x899   : > { %v3516_v0 = vpop.f32.mrb[48].mxu0 }
 0x89a   : > { %v3538_v1 = vpop.f32.mrb[48].mxu1  ;;  %v3517_v3 = vpop.f32.mrb[49].mxu0 }
 0x89b   : > { %v3518_v5 = vadd.f32 %v3517_v3, %v3516_v0  ;;  %v3539_v6 = vpop.f32.mrb[49].mxu1  ;;  %v3519_v8 = vpop.f32.mrb[50].mxu0 }
 0x89c   : > { %v3540_v10 = vadd.f32 %v3539_v6, %v3538_v1  ;;  %v3541_v11 = vpop.f32.mrb[50].mxu1  ;;  %v3520_v12 = vpop.f32.mrb[51].mxu0 }
 0x89d   : > { %v2923_v13 = vadd.f32 %v3518_v5, %v2883_v63  ;;  %v3542_v14 = vpop.f32.mrb[51].mxu1 }
 0x89f   : > { %v2963_v9 = vadd.f32 %v3540_v10, %v2923_v13 }
 0x8a1   : > { %v2968_v18 = vadd.f32 %v2963_v9, %v4214_v49  ;;  %v2984_v49 = vsub.s32 6, %v4120_v7 }
 0x8a3   : > { %v2969_v19 = vsel %vm405_vm2, %v2968_v18, 0.0  ;;  %v2985_v27 = vrot.slane %v4447_v29, %v2984_v49 }
 0x8a4   : > { %2970 = vadd.xlane.f32.xlu0 %v2969_v19 }
 0x931   : > { %v2971_v20 = vpop.xlane.xlu0 %2970 }
 0x932   : > { %v2972_v21 = vmul.f32 0.03125, %v2971_v20 }
 0x934   : > { %v2973_v22 = vsub.f32 %v2968_v18, %v2972_v21 }
 0x936   : > { %v2974_v23 = vmul.f32 %v2973_v22, %v2973_v22 }
 0x938   : > { %v2975_v24 = vsel %vm405_vm2, %v2974_v23, 0.0 }
 0x939   : > { %2976 = vadd.xlane.f32.xlu0 %v2975_v24 }
 0x9c6   : > { %v2977_v60 = vpop.xlane.xlu0 %2976 }
 0x9c7   : > { %v2978_v25 = vmul.f32 0.03125, %v2977_v60 }
 0x9c9   : > { %v2979_v26 = vadd.f32 1e-05, %v2978_v25 }
 0x9cb   : > { %3846 = vrsqrt.f32 %v2979_v26 }
 0x9d5   : > { %v3847_v16 = vpop.eup %3846 }
 0x9d6   : > { %v2981_v28 = vmul.f32 %v3847_v16, %v2973_v22 }
 0x9d8   : > { %v2986_v31 = vmul.f32 %v2985_v27, %v2981_v28 }
 0x9da   : > { %v2991_v32 = vadd.f32 %v2990_v30, %v2986_v31 }
 0x9dc   : > { %2992 = vst.msk [vmem:[%s4100_s27] sm:$0xff] %vm405_vm2, %v2991_v32 }
 0x9dd   : > { %3862 = shalt.err (!%p3859_p8)
}
 0x9de   : > { %s3863_s27 = scalar_lea.hbm %s4462_s11, 128  ;;  %s3867_s13 = scalar_lea.hbm %s4525_s6, 256 }
 0x9df   : > { %p3864_p10 = scmp.ne.s32.totalorder %s4462_s11, %s3863_s27  ;;  %p3868_p13 = scmp.lt.u32.totalorder %s4462_s11, %s4525_s6 }
 0x9e0   : > { %p3869_p0 = scmp.lt.u32.totalorder %s3867_s13, %s3863_s27  ;;  %p3871_p2 = scmp.lt.u32.totalorder %s3863_s27, %s4462_s11 }
 0x9e1   : > { %p3865_p11 = pnand %p3864_p10, %p4047_p3 }
 0x9e2   : > { %p3870_p1 = por %p3869_p0, %p3868_p13 }
 0x9e3   : > { %p3866_p12 = pneg %p3865_p11 }
 0x9e4   : > { %p3872_p4 = por %p3871_p2, %p3870_p1 }
 0x9e6   : > { %p3873_p5 = pnand %p3872_p4, %p3866_p12 }
 0x9e8   : > { %3876 = shalt.err (!%p3873_p5)
}
 0x9e9   : > { %3608 = dma.vmem_to_hbm [thread:$0]  (%p4047_p3), %s4464_s26, 128, %s4462_s11, %s2994_s21  }
 0x9ea PF: > { %s4546_s17 = sld [smem:[#allocation5_spill]]  ;;  %p3614_p6 = scmp.ge.s32.totalorder %s3943_s28, 2 }
 0x9ec   : > { %p3611_p7 = pnand %p3614_p6, %p4057_p9 }
 0x9f0   : > { %s3019_s30 = sand.u32 1, %s4546_s17  }
 0x9f1   : > { %s3020_s19 = scalar_lea.sflag [#allocation3], %s3019_s30 }
 0x9f2   : > { %3910 = dma.done.wait (!%p3611_p7), %s3020_s19, 128  }
 0x9f3   : > { %3912 = vsyncadd (!%p3611_p7), %s3020_s19, 4294967168  ;;  %s19_s28 = sadd.s32 1, %s3943_s28   ;;  %s4548_s20 = sld [smem:[#allocation6_spill]] }
 0x9f4   : > { %p16_p8 = scmp.ge.s32.totalorder %s19_s28, 6   ;;  %s4549_s23 = sld [smem:[#allocation12_spill]] }
 0x9f5   : > { %s4550_s24 = sld [smem:[#allocation7_spill]]  ;;  %s4551_s25 = sld [smem:[#allocation8_spill]] }
 0x9f6   : > { %s4552_s26 = sld [smem:[#allocation9_spill]]  ;;  %s4553_s27 = sld [smem:[#allocation10_spill]] }
 0x9f7   : > { %s4554_s21 = smov %s3919_s22  ;;  %18 = sbr.rel (!%p16_p8) target bundleno = 7 (0x7), region = 98 }
 0x9f9   : > { %s4555_s22 = smov %s4548_s20 }
 0x9fe   :  { %3025 = vsyncpa [#allocation3], 1 }
 0x9ff   :  { %3027 = vsyncpa [#allocation3 + $0x1], 1 }

</bundles_post_ra>
